<compile_context>
chip_gen: v6e
topology: v6e:2x2x1
jax: 0.10.0
libtpu: 0.0.40
codegen_flags: <defaults>
</compile_context>

<pallas_src>
import math
import functools

import jax
import jax.numpy as jnp
from jax.experimental import pallas as pl
from jax.experimental.pallas import tpu as pltpu


def _round_up(v, m):
    return ((v + m - 1) // m) * m


# ----------------------------------------------------------------------------
# Fused kernel: timestep embedding + time_embed MLP + proj MLP + add +
#               Simple_FF + output head, all at uniform padded width D.
# ----------------------------------------------------------------------------
def _fused_mlp_kernel(n_ff, half, D, io_pad,
                      x_ref, ts_ref, f_ref, w_ref, b_ref, o_ref):
    """x_ref:(TB,io_pad) f32 input; ts_ref:(TB,1) f32 timesteps;
       f_ref:(1,D) f32 sinusoidal freqs (cos half | sin half | zeros);
       w_ref:(n_layers*D, D) bf16 packed zero-padded weights (stored (in,out));
       b_ref:(n_pad, D) f32 packed zero-padded biases; o_ref:(TB,D) f32."""

    def linear(h, idx, k=D):
        # bf16 x bf16 matmul on the MXU, f32 accumulation, f32 bias add.
        w = w_ref[idx * D: idx * D + k, :]               # (k, D) static slice
        b = b_ref[idx:idx + 1, :]                        # (1, D) f32
        return jnp.dot(h.astype(jnp.bfloat16), w,
                       preferred_element_type=jnp.float32) + b

    def silu(v):
        return v * jax.nn.sigmoid(v)

    def relu(v):
        return jnp.maximum(v, 0.0)

    # --- fused sinusoidal timestep embedding (lane-dense at width D) --------
    # freqs precomputed on host; lanes [0, half) -> cos, [half, 2*half) -> sin,
    # remaining lanes (odd-dim zero column + lane padding) stay exactly 0.
    # cos/sin are evaluated over the full width (EUP filler hidden under MXU).
    args = ts_ref[...] * f_ref[...]                      # (TB, D) f32
    j = jax.lax.broadcasted_iota(jnp.int32, (1, D), 1)
    temb = jnp.where(j < half, jnp.cos(args),
                     jnp.where(j < 2 * half, jnp.sin(args), 0.0))

    # time_embed: Linear -> SiLU -> Linear
    emb = linear(silu(linear(temb, 0)), 1)

    # proj: Linear -> SiLU -> Linear (K = io_pad on the first one), add temb
    h = linear(silu(linear(x_ref[...], 2, k=io_pad)), 3) + emb

    # Simple_FF: ReLU(Linear) per layer
    for i in range(n_ff):
        h = relu(linear(h, 4 + i))

    # output head: ReLU(Linear)
    h = relu(linear(h, 4 + n_ff))
    o_ref[...] = h.astype(o_ref.dtype)


# ----------------------------------------------------------------------------
# Parameter construction (torch-Linear-like uniform init, weights as (in, out))
# ----------------------------------------------------------------------------
def init_params(key, io_dim, hidden_size, time_dim):
    dims = [(time_dim, time_dim), (time_dim, time_dim),      # time_embed
            (io_dim, time_dim), (time_dim, time_dim)]        # proj
    ff = [time_dim, *hidden_size]
    dims += [(ff[i], ff[i + 1]) for i in range(len(ff) - 1)]  # feed_forward
    dims += [(hidden_size[-1], io_dim)]                       # output head

    layers = []
    for d_in, d_out in dims:
        key, kw, kb = jax.random.split(key, 3)
        bound = 1.0 / math.sqrt(d_in)
        w = jax.random.uniform(kw, (d_in, d_out), jnp.float32, -bound, bound)
        b = jax.random.uniform(kb, (d_out,), jnp.float32, -bound, bound)
        layers.append((w, b))
    return layers


def pack_params(layers, D, time_dim, max_period=10000.0):
    """Pack all (w, b) into one zero-padded bf16 (n*D, D) weight blob, one
    f32 (round_up(n,8), D) bias blob, and the precomputed (1, D) freqs row.
    Done once, outside the hot path."""
    n = len(layers)
    n_pad = _round_up(n, 8)
    w_packed = jnp.zeros((n * D, D), jnp.float32)
    b_packed = jnp.zeros((n_pad, D), jnp.float32)
    for i, (w, b) in enumerate(layers):
        d_in, d_out = w.shape
        w_packed = w_packed.at[i * D:i * D + d_in, :d_out].set(w)
        b_packed = b_packed.at[i, :d_out].set(b)
    w_packed = w_packed.astype(jnp.bfloat16)   # native MXU dtype, half the DMA

    half = time_dim // 2
    base = jnp.exp(-math.log(max_period)
                   * jnp.arange(half, dtype=jnp.float32) / half)
    freqs_row = jnp.zeros((1, D), jnp.float32)
    freqs_row = freqs_row.at[0, :half].set(base).at[0, half:2 * half].set(base)
    return w_packed, b_packed, freqs_row


# ----------------------------------------------------------------------------
# Wrapper
# ----------------------------------------------------------------------------
def unconditioned_time_embedding_mlp(x, timesteps, w_packed, b_packed,
                                     freqs_row, io_dim, hidden_size, time_dim,
                                     max_tb=256, return_padded=False):
    B = x.shape[0]
    n_ff = len(hidden_size)
    n_layers = 4 + n_ff + 1
    D = w_packed.shape[1]
    n_pad = b_packed.shape[0]
    half = time_dim // 2
    io_pad = _round_up(io_dim, 16)      # sublane-friendly input width (<< 128)

    # Batch tile: as large as max_tb, but keep >= 2 grid steps when the
    # 8-padded batch allows so "parallel" actually shards across v7x's 2 TCs.
    Bp0 = _round_up(B, 8)
    if Bp0 >= 16:
        TB = min(max_tb, max(8, _round_up(Bp0 // 2, 8)))
    else:
        TB = Bp0
    Bp = _round_up(Bp0, TB)

    # Narrow (io_pad-wide) zero-padded input + timesteps; no 128-lane inflate.
    xp = jnp.zeros((Bp, io_pad), jnp.float32).at[:B, :io_dim].set(
        x.astype(jnp.float32))
    tp = jnp.zeros((Bp, 1), jnp.float32).at[:B, 0].set(
        timesteps.astype(jnp.float32))

    kernel = functools.partial(_fused_mlp_kernel, n_ff, half, D, io_pad)

    def run(single_buffer_consts):
        def const_spec(shape):
            # Constant index_map -> blob never changes; single-buffer it.
            if single_buffer_consts:
                return pl.BlockSpec(shape, lambda i: (0, 0),
                                    pipeline_mode=pl.Buffered(1))
            return pl.BlockSpec(shape, lambda i: (0, 0))

        out = pl.pallas_call(
            kernel,
            out_shape=jax.ShapeDtypeStruct((Bp, D), jnp.float32),
            grid=(Bp // TB,),
            in_specs=[
                pl.BlockSpec((TB, io_pad), lambda i: (i, 0)),   # x tile
                pl.BlockSpec((TB, 1), lambda i: (i, 0)),        # timesteps
                const_spec((1, D)),                             # freqs (resident)
                const_spec((n_layers * D, D)),                  # weights (resident)
                const_spec((n_pad, D)),                         # biases (resident)
            ],
            out_specs=pl.BlockSpec((TB, D), lambda i: (i, 0)),
            compiler_params=pltpu.CompilerParams(
                dimension_semantics=("parallel",)),             # megacore on v7x
        )(xp, tp, freqs_row, w_packed, b_packed)
        return jax.block_until_ready(out)

    try:
        out = run(True)
    except Exception:
        # Older JAX without BlockSpec pipeline_mode / Buffered(1) support.
        out = run(False)

    if return_padded:
        return out              # lane-dense (Bp, D); slice lazily at use site
    return out[:B, :io_dim]


# ----------------------------------------------------------------------------
# Pure-JAX reference (correctness check, full f32)
# ----------------------------------------------------------------------------
def timestep_embedding_ref(timesteps, dim_out, max_period=10000.0):
    half = dim_out // 2
    freqs = jnp.exp(
        -math.log(max_period) * jnp.arange(half, dtype=jnp.float32) / half)
    args = timesteps.astype(jnp.float32)[:, None] * freqs[None, :]
    emb = jnp.concatenate([jnp.cos(args), jnp.sin(args)], axis=-1)
    if dim_out % 2:
        emb = jnp.concatenate([emb, jnp.zeros_like(emb[:, :1])], axis=-1)
    return emb


def reference_forward(x, timesteps, layers, io_dim, hidden_size, time_dim):
    silu = lambda v: v * jax.nn.sigmoid(v)
    relu = lambda v: jnp.maximum(v, 0.0)
    lin = lambda h, l: h @ l[0] + l[1]

    temb = timestep_embedding_ref(timesteps, time_dim)
    emb = lin(silu(lin(temb, layers[0])), layers[1])
    h = lin(silu(lin(x, layers[2])), layers[3]) + emb
    for i in range(len(hidden_size)):
        h = relu(lin(h, layers[4 + i]))
    h = relu(lin(h, layers[4 + len(hidden_size)]))
    return h


if __name__ == "__main__":
    io_dim = 16
    time_dim = 64
    hidden_size = [32, 32]
    batch = 8

    key = jax.random.PRNGKey(0)
    key, kx, kt, kp = jax.random.split(key, 4)

    x = jax.random.normal(kx, (batch, io_dim), jnp.float32)
    timesteps = jax.random.randint(kt, (batch,), 0, 1000).astype(jnp.float32)
    layers = init_params(kp, io_dim, hidden_size, time_dim)

    # Uniform padded width for all layers (tiny here; re-derive the resident
    # weight budget against v7x's 64 MiB only if hidden dims grow to 1-2K).
    D = _round_up(max(io_dim, time_dim, *hidden_size), 128)
    w_packed, b_packed, freqs_row = pack_params(layers, D, time_dim)

    out = unconditioned_time_embedding_mlp(
        x, timesteps, w_packed, b_packed, freqs_row,
        io_dim, hidden_size, time_dim)
    out = jax.block_until_ready(out)

    ref = reference_forward(x, timesteps, layers, io_dim, hidden_size, time_dim)
    assert out.shape == (batch, io_dim)
    # Tolerance covers bf16 weight/activation quantization (f32 accumulation)
    # plus in-kernel vs XLA sin/cos rounding at args up to ~1000.
    assert jnp.allclose(out, ref, atol=3e-2, rtol=3e-2), (
        "mismatch vs reference: max abs err "
        f"{float(jnp.max(jnp.abs(out - ref)))}")

    print("KERNEL_OK")
</pallas_src>

<mosaic_0001>
module attributes {stable_mosaic.version = 11 : i64} {
  func.func @_fused_mlp_kernel(%arg0: i32, %arg1: memref<8x16xf32, #tpu.memory_space<vmem>>, %arg2: memref<8x1xf32, #tpu.memory_space<vmem>>, %arg3: memref<1x128xf32, #tpu.memory_space<vmem>>, %arg4: memref<896x128xbf16, #tpu.memory_space<vmem>>, %arg5: memref<8x128xf32, #tpu.memory_space<vmem>>, %arg6: memref<8x128xf32, #tpu.memory_space<vmem>>) attributes {dimension_semantics = [#tpu.dimension_semantics<parallel>], iteration_bounds = array<i64: 1>, scalar_prefetch = 0 : i64, scratch_operands = 0 : i64, tpu.core_type = #tpu.core_type<tc>, window_params = [{transform_indices = @transform_0, window_bounds = array<i64: 8, 16>}, {transform_indices = @transform_1, window_bounds = array<i64: 8, 1>}, {pipeline_mode = #tpu.pipeline_mode<synchronous>, transform_indices = @transform_2, window_bounds = array<i64: 1, 128>}, {pipeline_mode = #tpu.pipeline_mode<synchronous>, transform_indices = @transform_3, window_bounds = array<i64: 896, 128>}, {pipeline_mode = #tpu.pipeline_mode<synchronous>, transform_indices = @transform_4, window_bounds = array<i64: 8, 128>}, {transform_indices = @transform_5, window_bounds = array<i64: 8, 128>}]} {
    %c0 = arith.constant 0 : index
    %c0_0 = arith.constant 0 : index
    %0 = vector.load %arg2[%c0, %c0_0] : memref<8x1xf32, #tpu.memory_space<vmem>>, vector<8x1xf32>
    %c0_1 = arith.constant 0 : index
    %c0_2 = arith.constant 0 : index
    %1 = vector.load %arg3[%c0_1, %c0_2] : memref<1x128xf32, #tpu.memory_space<vmem>>, vector<1x128xf32>
    %2 = vector.broadcast %0 : vector<8x1xf32> to vector<8x128xf32>
    %3 = vector.broadcast %1 : vector<1x128xf32> to vector<8x128xf32>
    %4 = arith.mulf %2, %3 : vector<8x128xf32>
    %5 = tpu.iota {dimensions = array<i32: 1>} : vector<1x128xi32>
    %c32_i32 = arith.constant 32 : i32
    %6 = vector.broadcast %c32_i32 : i32 to vector<1x128xi32>
    %7 = arith.cmpi slt, %5, %6 : vector<1x128xi32>
    %8 = math.cos %4 : vector<8x128xf32>
    %c64_i32 = arith.constant 64 : i32
    %9 = vector.broadcast %c64_i32 : i32 to vector<1x128xi32>
    %10 = arith.cmpi slt, %5, %9 : vector<1x128xi32>
    %11 = math.sin %4 : vector<8x128xf32>
    %cst = arith.constant 0.000000e+00 : f32
    %12 = vector.shape_cast %10 : vector<1x128xi1> to vector<1x128xi1>
    %13 = vector.broadcast %12 : vector<1x128xi1> to vector<8x128xi1>
    %14 = vector.broadcast %cst : f32 to vector<8x128xf32>
    %15 = arith.select %13, %11, %14 : vector<8x128xi1>, vector<8x128xf32>
    %16 = vector.shape_cast %7 : vector<1x128xi1> to vector<1x128xi1>
    %17 = vector.broadcast %16 : vector<1x128xi1> to vector<8x128xi1>
    %18 = arith.select %17, %8, %15 : vector<8x128xi1>, vector<8x128xf32>
    %c0_3 = arith.constant 0 : index
    %c0_4 = arith.constant 0 : index
    %19 = vector.load %arg4[%c0_3, %c0_4] : memref<896x128xbf16, #tpu.memory_space<vmem>>, vector<128x128xbf16>
    %c0_5 = arith.constant 0 : index
    %c0_6 = arith.constant 0 : index
    %20 = vector.load %arg5[%c0_5, %c0_6] : memref<8x128xf32, #tpu.memory_space<vmem>>, vector<1x128xf32>
    %21 = arith.truncf %18 : vector<8x128xf32> to vector<8x128xbf16>
    %cst_7 = arith.constant dense<0.000000e+00> : vector<8x128xf32>
    %22 = tpu.matmul %21, %19, %cst_7 {dimension_numbers = #tpu.dot_dimension_numbers<[1], [0], [0], [1], [0, 0, 1, 1], [], []>} : vector<8x128xbf16>, vector<128x128xbf16>, vector<8x128xf32> -> vector<8x128xf32>
    %23 = vector.broadcast %20 : vector<1x128xf32> to vector<8x128xf32>
    %24 = arith.addf %22, %23 : vector<8x128xf32>
    %25 = arith.negf %24 : vector<8x128xf32>
    %26 = math.exp %25 : vector<8x128xf32>
    %cst_8 = arith.constant 1.000000e+00 : f32
    %27 = vector.broadcast %cst_8 : f32 to vector<8x128xf32>
    %28 = arith.addf %27, %26 : vector<8x128xf32>
    %29 = arith.divf %27, %28 : vector<8x128xf32>
    %30 = arith.mulf %24, %29 : vector<8x128xf32>
    %c128 = arith.constant 128 : index
    %c0_9 = arith.constant 0 : index
    %31 = vector.load %arg4[%c128, %c0_9] : memref<896x128xbf16, #tpu.memory_space<vmem>>, vector<128x128xbf16>
    %c1 = arith.constant 1 : index
    %c0_10 = arith.constant 0 : index
    %32 = vector.load %arg5[%c1, %c0_10] : memref<8x128xf32, #tpu.memory_space<vmem>>, vector<1x128xf32>
    %33 = arith.truncf %30 : vector<8x128xf32> to vector<8x128xbf16>
    %cst_11 = arith.constant dense<0.000000e+00> : vector<8x128xf32>
    %34 = tpu.matmul %33, %31, %cst_11 {dimension_numbers = #tpu.dot_dimension_numbers<[1], [0], [0], [1], [0, 0, 1, 1], [], []>} : vector<8x128xbf16>, vector<128x128xbf16>, vector<8x128xf32> -> vector<8x128xf32>
    %35 = vector.broadcast %32 : vector<1x128xf32> to vector<8x128xf32>
    %36 = arith.addf %34, %35 : vector<8x128xf32>
    %c0_12 = arith.constant 0 : index
    %c0_13 = arith.constant 0 : index
    %37 = vector.load %arg1[%c0_12, %c0_13] : memref<8x16xf32, #tpu.memory_space<vmem>>, vector<8x16xf32>
    %c256 = arith.constant 256 : index
    %c0_14 = arith.constant 0 : index
    %38 = vector.load %arg4[%c256, %c0_14] : memref<896x128xbf16, #tpu.memory_space<vmem>>, vector<16x128xbf16>
    %c2 = arith.constant 2 : index
    %c0_15 = arith.constant 0 : index
    %39 = vector.load %arg5[%c2, %c0_15] : memref<8x128xf32, #tpu.memory_space<vmem>>, vector<1x128xf32>
    %40 = arith.truncf %37 : vector<8x16xf32> to vector<8x16xbf16>
    %cst_16 = arith.constant dense<0.000000e+00> : vector<8x128xf32>
    %41 = tpu.matmul %40, %38, %cst_16 {dimension_numbers = #tpu.dot_dimension_numbers<[1], [0], [0], [1], [0, 0, 1, 1], [], []>} : vector<8x16xbf16>, vector<16x128xbf16>, vector<8x128xf32> -> vector<8x128xf32>
    %42 = vector.broadcast %39 : vector<1x128xf32> to vector<8x128xf32>
    %43 = arith.addf %41, %42 : vector<8x128xf32>
    %44 = arith.negf %43 : vector<8x128xf32>
    %45 = math.exp %44 : vector<8x128xf32>
    %cst_17 = arith.constant 1.000000e+00 : f32
    %46 = vector.broadcast %cst_17 : f32 to vector<8x128xf32>
    %47 = arith.addf %46, %45 : vector<8x128xf32>
    %48 = arith.divf %46, %47 : vector<8x128xf32>
    %49 = arith.mulf %43, %48 : vector<8x128xf32>
    %c384 = arith.constant 384 : index
    %c0_18 = arith.constant 0 : index
    %50 = vector.load %arg4[%c384, %c0_18] : memref<896x128xbf16, #tpu.memory_space<vmem>>, vector<128x128xbf16>
    %c3 = arith.constant 3 : index
    %c0_19 = arith.constant 0 : index
    %51 = vector.load %arg5[%c3, %c0_19] : memref<8x128xf32, #tpu.memory_space<vmem>>, vector<1x128xf32>
    %52 = arith.truncf %49 : vector<8x128xf32> to vector<8x128xbf16>
    %cst_20 = arith.constant dense<0.000000e+00> : vector<8x128xf32>
    %53 = tpu.matmul %52, %50, %cst_20 {dimension_numbers = #tpu.dot_dimension_numbers<[1], [0], [0], [1], [0, 0, 1, 1], [], []>} : vector<8x128xbf16>, vector<128x128xbf16>, vector<8x128xf32> -> vector<8x128xf32>
    %54 = vector.broadcast %51 : vector<1x128xf32> to vector<8x128xf32>
    %55 = arith.addf %53, %54 : vector<8x128xf32>
    %56 = arith.addf %55, %36 : vector<8x128xf32>
    %c512 = arith.constant 512 : index
    %c0_21 = arith.constant 0 : index
    %57 = vector.load %arg4[%c512, %c0_21] : memref<896x128xbf16, #tpu.memory_space<vmem>>, vector<128x128xbf16>
    %c4 = arith.constant 4 : index
    %c0_22 = arith.constant 0 : index
    %58 = vector.load %arg5[%c4, %c0_22] : memref<8x128xf32, #tpu.memory_space<vmem>>, vector<1x128xf32>
    %59 = arith.truncf %56 : vector<8x128xf32> to vector<8x128xbf16>
    %cst_23 = arith.constant dense<0.000000e+00> : vector<8x128xf32>
    %60 = tpu.matmul %59, %57, %cst_23 {dimension_numbers = #tpu.dot_dimension_numbers<[1], [0], [0], [1], [0, 0, 1, 1], [], []>} : vector<8x128xbf16>, vector<128x128xbf16>, vector<8x128xf32> -> vector<8x128xf32>
    %61 = vector.broadcast %58 : vector<1x128xf32> to vector<8x128xf32>
    %62 = arith.addf %60, %61 : vector<8x128xf32>
    %cst_24 = arith.constant 0.000000e+00 : f32
    %63 = vector.broadcast %cst_24 : f32 to vector<8x128xf32>
    %64 = arith.maximumf %62, %63 : vector<8x128xf32>
    %c640 = arith.constant 640 : index
    %c0_25 = arith.constant 0 : index
    %65 = vector.load %arg4[%c640, %c0_25] : memref<896x128xbf16, #tpu.memory_space<vmem>>, vector<128x128xbf16>
    %c5 = arith.constant 5 : index
    %c0_26 = arith.constant 0 : index
    %66 = vector.load %arg5[%c5, %c0_26] : memref<8x128xf32, #tpu.memory_space<vmem>>, vector<1x128xf32>
    %67 = arith.truncf %64 : vector<8x128xf32> to vector<8x128xbf16>
    %cst_27 = arith.constant dense<0.000000e+00> : vector<8x128xf32>
    %68 = tpu.matmul %67, %65, %cst_27 {dimension_numbers = #tpu.dot_dimension_numbers<[1], [0], [0], [1], [0, 0, 1, 1], [], []>} : vector<8x128xbf16>, vector<128x128xbf16>, vector<8x128xf32> -> vector<8x128xf32>
    %69 = vector.broadcast %66 : vector<1x128xf32> to vector<8x128xf32>
    %70 = arith.addf %68, %69 : vector<8x128xf32>
    %cst_28 = arith.constant 0.000000e+00 : f32
    %71 = vector.broadcast %cst_28 : f32 to vector<8x128xf32>
    %72 = arith.maximumf %70, %71 : vector<8x128xf32>
    %c768 = arith.constant 768 : index
    %c0_29 = arith.constant 0 : index
    %73 = vector.load %arg4[%c768, %c0_29] : memref<896x128xbf16, #tpu.memory_space<vmem>>, vector<128x128xbf16>
    %c6 = arith.constant 6 : index
    %c0_30 = arith.constant 0 : index
    %74 = vector.load %arg5[%c6, %c0_30] : memref<8x128xf32, #tpu.memory_space<vmem>>, vector<1x128xf32>
    %75 = arith.truncf %72 : vector<8x128xf32> to vector<8x128xbf16>
    %cst_31 = arith.constant dense<0.000000e+00> : vector<8x128xf32>
    %76 = tpu.matmul %75, %73, %cst_31 {dimension_numbers = #tpu.dot_dimension_numbers<[1], [0], [0], [1], [0, 0, 1, 1], [], []>} : vector<8x128xbf16>, vector<128x128xbf16>, vector<8x128xf32> -> vector<8x128xf32>
    %77 = vector.broadcast %74 : vector<1x128xf32> to vector<8x128xf32>
    %78 = arith.addf %76, %77 : vector<8x128xf32>
    %cst_32 = arith.constant 0.000000e+00 : f32
    %79 = vector.broadcast %cst_32 : f32 to vector<8x128xf32>
    %80 = arith.maximumf %78, %79 : vector<8x128xf32>
    %c0_33 = arith.constant 0 : index
    %c0_34 = arith.constant 0 : index
    %81 = vector.load %arg6[%c0_33, %c0_34] : memref<8x128xf32, #tpu.memory_space<vmem>>, vector<8x128xf32>
    tpu.vector_store %arg6[%c0_33, %c0_34], %80 {strides = array<i32>} : memref<8x128xf32, #tpu.memory_space<vmem>>, vector<8x128xf32>,
    return
  }
  func.func @transform_0(%arg0: i32) -> (i32, i32) {
    %c0_i32 = arith.constant 0 : i32
    %c0_i32_0 = arith.constant 0 : i32
    return %arg0, %c0_i32 : i32, i32
  }
  func.func @transform_1(%arg0: i32) -> (i32, i32) {
    %c0_i32 = arith.constant 0 : i32
    %c0_i32_0 = arith.constant 0 : i32
    return %arg0, %c0_i32 : i32, i32
  }
  func.func @transform_2(%arg0: i32) -> (i32, i32) {
    %c0_i32 = arith.constant 0 : i32
    %c0_i32_0 = arith.constant 0 : i32
    %c0_i32_1 = arith.constant 0 : i32
    return %c0_i32, %c0_i32_0 : i32, i32
  }
  func.func @transform_3(%arg0: i32) -> (i32, i32) {
    %c0_i32 = arith.constant 0 : i32
    %c0_i32_0 = arith.constant 0 : i32
    %c0_i32_1 = arith.constant 0 : i32
    return %c0_i32, %c0_i32_0 : i32, i32
  }
  func.func @transform_4(%arg0: i32) -> (i32, i32) {
    %c0_i32 = arith.constant 0 : i32
    %c0_i32_0 = arith.constant 0 : i32
    %c0_i32_1 = arith.constant 0 : i32
    return %c0_i32, %c0_i32_0 : i32, i32
  }
  func.func @transform_5(%arg0: i32) -> (i32, i32) {
    %c0_i32 = arith.constant 0 : i32
    %c0_i32_0 = arith.constant 0 : i32
    return %arg0, %c0_i32 : i32, i32
  }
}

module attributes {stable_mosaic.version = 11 : i64} {
  func.func @_fused_mlp_kernel(%arg0: i32, %arg1: memref<8x16xf32, #tpu.memory_space<vmem>>, %arg2: memref<8x1xf32, #tpu.memory_space<vmem>>, %arg3: memref<1x128xf32, #tpu.memory_space<vmem>>, %arg4: memref<896x128xbf16, #tpu.memory_space<vmem>>, %arg5: memref<8x128xf32, #tpu.memory_space<vmem>>, %arg6: memref<8x128xf32, #tpu.memory_space<vmem>>) attributes {dimension_semantics = [#tpu.dimension_semantics<parallel>], iteration_bounds = array<i64: 1>, scalar_prefetch = 0 : i64, scratch_operands = 0 : i64, tpu.core_type = #tpu.core_type<tc>, window_params = [{transform_indices = @transform_0, window_bounds = array<i64: 8, 16>}, {transform_indices = @transform_1, window_bounds = array<i64: 8, 1>}, {pipeline_mode = #tpu.pipeline_mode<synchronous>, transform_indices = @transform_2, window_bounds = array<i64: 1, 128>}, {pipeline_mode = #tpu.pipeline_mode<synchronous>, transform_indices = @transform_3, window_bounds = array<i64: 896, 128>}, {pipeline_mode = #tpu.pipeline_mode<synchronous>, transform_indices = @transform_4, window_bounds = array<i64: 8, 128>}, {transform_indices = @transform_5, window_bounds = array<i64: 8, 128>}]} {
    %c0 = arith.constant 0 : index
    %c0_0 = arith.constant 0 : index
    %0 = vector.load %arg2[%c0, %c0_0] : memref<8x1xf32, #tpu.memory_space<vmem>>, vector<8x1xf32>
    %c0_1 = arith.constant 0 : index
    %c0_2 = arith.constant 0 : index
    %1 = vector.load %arg3[%c0_1, %c0_2] : memref<1x128xf32, #tpu.memory_space<vmem>>, vector<1x128xf32>
    %2 = vector.broadcast %0 : vector<8x1xf32> to vector<8x128xf32>
    %3 = vector.broadcast %1 : vector<1x128xf32> to vector<8x128xf32>
    %4 = arith.mulf %2, %3 : vector<8x128xf32>
    %5 = tpu.iota {dimensions = array<i32: 1>} : vector<1x128xi32>
    %c32_i32 = arith.constant 32 : i32
    %6 = vector.broadcast %c32_i32 : i32 to vector<1x128xi32>
    %7 = arith.cmpi slt, %5, %6 : vector<1x128xi32>
    %8 = math.cos %4 : vector<8x128xf32>
    %c64_i32 = arith.constant 64 : i32
    %9 = vector.broadcast %c64_i32 : i32 to vector<1x128xi32>
    %10 = arith.cmpi slt, %5, %9 : vector<1x128xi32>
    %11 = math.sin %4 : vector<8x128xf32>
    %cst = arith.constant 0.000000e+00 : f32
    %12 = vector.shape_cast %10 : vector<1x128xi1> to vector<1x128xi1>
    %13 = vector.broadcast %12 : vector<1x128xi1> to vector<8x128xi1>
    %14 = vector.broadcast %cst : f32 to vector<8x128xf32>
    %15 = arith.select %13, %11, %14 : vector<8x128xi1>, vector<8x128xf32>
    %16 = vector.shape_cast %7 : vector<1x128xi1> to vector<1x128xi1>
    %17 = vector.broadcast %16 : vector<1x128xi1> to vector<8x128xi1>
    %18 = arith.select %17, %8, %15 : vector<8x128xi1>, vector<8x128xf32>
    %c0_3 = arith.constant 0 : index
    %c0_4 = arith.constant 0 : index
    %19 = vector.load %arg4[%c0_3, %c0_4] : memref<896x128xbf16, #tpu.memory_space<vmem>>, vector<128x128xbf16>
    %c0_5 = arith.constant 0 : index
    %c0_6 = arith.constant 0 : index
    %20 = vector.load %arg5[%c0_5, %c0_6] : memref<8x128xf32, #tpu.memory_space<vmem>>, vector<1x128xf32>
    %21 = arith.truncf %18 : vector<8x128xf32> to vector<8x128xbf16>
    %cst_7 = arith.constant dense<0.000000e+00> : vector<8x128xf32>
    %22 = tpu.matmul %21, %19, %cst_7 {dimension_numbers = #tpu.dot_dimension_numbers<[1], [0], [0], [1], [0, 0, 1, 1], [], []>} : vector<8x128xbf16>, vector<128x128xbf16>, vector<8x128xf32> -> vector<8x128xf32>
    %23 = vector.broadcast %20 : vector<1x128xf32> to vector<8x128xf32>
    %24 = arith.addf %22, %23 : vector<8x128xf32>
    %25 = arith.negf %24 : vector<8x128xf32>
    %26 = math.exp %25 : vector<8x128xf32>
    %cst_8 = arith.constant 1.000000e+00 : f32
    %27 = vector.broadcast %cst_8 : f32 to vector<8x128xf32>
    %28 = arith.addf %27, %26 : vector<8x128xf32>
    %29 = arith.divf %27, %28 : vector<8x128xf32>
    %30 = arith.mulf %24, %29 : vector<8x128xf32>
    %c128 = arith.constant 128 : index
    %c0_9 = arith.constant 0 : index
    %31 = vector.load %arg4[%c128, %c0_9] : memref<896x128xbf16, #tpu.memory_space<vmem>>, vector<128x128xbf16>
    %c1 = arith.constant 1 : index
    %c0_10 = arith.constant 0 : index
    %32 = vector.load %arg5[%c1, %c0_10] : memref<8x128xf32, #tpu.memory_space<vmem>>, vector<1x128xf32>
    %33 = arith.truncf %30 : vector<8x128xf32> to vector<8x128xbf16>
    %cst_11 = arith.constant dense<0.000000e+00> : vector<8x128xf32>
    %34 = tpu.matmul %33, %31, %cst_11 {dimension_numbers = #tpu.dot_dimension_numbers<[1], [0], [0], [1], [0, 0, 1, 1], [], []>} : vector<8x128xbf16>, vector<128x128xbf16>, vector<8x128xf32> -> vector<8x128xf32>
    %35 = vector.broadcast %32 : vector<1x128xf32> to vector<8x128xf32>
    %36 = arith.addf %34, %35 : vector<8x128xf32>
    %c0_12 = arith.constant 0 : index
    %c0_13 = arith.constant 0 : index
    %37 = vector.load %arg1[%c0_12, %c0_13] : memref<8x16xf32, #tpu.memory_space<vmem>>, vector<8x16xf32>
    %c256 = arith.constant 256 : index
    %c0_14 = arith.constant 0 : index
    %38 = vector.load %arg4[%c256, %c0_14] : memref<896x128xbf16, #tpu.memory_space<vmem>>, vector<16x128xbf16>
    %c2 = arith.constant 2 : index
    %c0_15 = arith.constant 0 : index
    %39 = vector.load %arg5[%c2, %c0_15] : memref<8x128xf32, #tpu.memory_space<vmem>>, vector<1x128xf32>
    %40 = arith.truncf %37 : vector<8x16xf32> to vector<8x16xbf16>
    %cst_16 = arith.constant dense<0.000000e+00> : vector<8x128xf32>
    %41 = tpu.matmul %40, %38, %cst_16 {dimension_numbers = #tpu.dot_dimension_numbers<[1], [0], [0], [1], [0, 0, 1, 1], [], []>} : vector<8x16xbf16>, vector<16x128xbf16>, vector<8x128xf32> -> vector<8x128xf32>
    %42 = vector.broadcast %39 : vector<1x128xf32> to vector<8x128xf32>
    %43 = arith.addf %41, %42 : vector<8x128xf32>
    %44 = arith.negf %43 : vector<8x128xf32>
    %45 = math.exp %44 : vector<8x128xf32>
    %cst_17 = arith.constant 1.000000e+00 : f32
    %46 = vector.broadcast %cst_17 : f32 to vector<8x128xf32>
    %47 = arith.addf %46, %45 : vector<8x128xf32>
    %48 = arith.divf %46, %47 : vector<8x128xf32>
    %49 = arith.mulf %43, %48 : vector<8x128xf32>
    %c384 = arith.constant 384 : index
    %c0_18 = arith.constant 0 : index
    %50 = vector.load %arg4[%c384, %c0_18] : memref<896x128xbf16, #tpu.memory_space<vmem>>, vector<128x128xbf16>
    %c3 = arith.constant 3 : index
    %c0_19 = arith.constant 0 : index
    %51 = vector.load %arg5[%c3, %c0_19] : memref<8x128xf32, #tpu.memory_space<vmem>>, vector<1x128xf32>
    %52 = arith.truncf %49 : vector<8x128xf32> to vector<8x128xbf16>
    %cst_20 = arith.constant dense<0.000000e+00> : vector<8x128xf32>
    %53 = tpu.matmul %52, %50, %cst_20 {dimension_numbers = #tpu.dot_dimension_numbers<[1], [0], [0], [1], [0, 0, 1, 1], [], []>} : vector<8x128xbf16>, vector<128x128xbf16>, vector<8x128xf32> -> vector<8x128xf32>
    %54 = vector.broadcast %51 : vector<1x128xf32> to vector<8x128xf32>
    %55 = arith.addf %53, %54 : vector<8x128xf32>
    %56 = arith.addf %55, %36 : vector<8x128xf32>
    %c512 = arith.constant 512 : index
    %c0_21 = arith.constant 0 : index
    %57 = vector.load %arg4[%c512, %c0_21] : memref<896x128xbf16, #tpu.memory_space<vmem>>, vector<128x128xbf16>
    %c4 = arith.constant 4 : index
    %c0_22 = arith.constant 0 : index
    %58 = vector.load %arg5[%c4, %c0_22] : memref<8x128xf32, #tpu.memory_space<vmem>>, vector<1x128xf32>
    %59 = arith.truncf %56 : vector<8x128xf32> to vector<8x128xbf16>
    %cst_23 = arith.constant dense<0.000000e+00> : vector<8x128xf32>
    %60 = tpu.matmul %59, %57, %cst_23 {dimension_numbers = #tpu.dot_dimension_numbers<[1], [0], [0], [1], [0, 0, 1, 1], [], []>} : vector<8x128xbf16>, vector<128x128xbf16>, vector<8x128xf32> -> vector<8x128xf32>
    %61 = vector.broadcast %58 : vector<1x128xf32> to vector<8x128xf32>
    %62 = arith.addf %60, %61 : vector<8x128xf32>
    %cst_24 = arith.constant 0.000000e+00 : f32
    %63 = vector.broadcast %cst_24 : f32 to vector<8x128xf32>
    %64 = arith.maximumf %62, %63 : vector<8x128xf32>
    %c640 = arith.constant 640 : index
    %c0_25 = arith.constant 0 : index
    %65 = vector.load %arg4[%c640, %c0_25] : memref<896x128xbf16, #tpu.memory_space<vmem>>, vector<128x128xbf16>
    %c5 = arith.constant 5 : index
    %c0_26 = arith.constant 0 : index
    %66 = vector.load %arg5[%c5, %c0_26] : memref<8x128xf32, #tpu.memory_space<vmem>>, vector<1x128xf32>
    %67 = arith.truncf %64 : vector<8x128xf32> to vector<8x128xbf16>
    %cst_27 = arith.constant dense<0.000000e+00> : vector<8x128xf32>
    %68 = tpu.matmul %67, %65, %cst_27 {dimension_numbers = #tpu.dot_dimension_numbers<[1], [0], [0], [1], [0, 0, 1, 1], [], []>} : vector<8x128xbf16>, vector<128x128xbf16>, vector<8x128xf32> -> vector<8x128xf32>
    %69 = vector.broadcast %66 : vector<1x128xf32> to vector<8x128xf32>
    %70 = arith.addf %68, %69 : vector<8x128xf32>
    %cst_28 = arith.constant 0.000000e+00 : f32
    %71 = vector.broadcast %cst_28 : f32 to vector<8x128xf32>
    %72 = arith.maximumf %70, %71 : vector<8x128xf32>
    %c768 = arith.constant 768 : index
    %c0_29 = arith.constant 0 : index
    %73 = vector.load %arg4[%c768, %c0_29] : memref<896x128xbf16, #tpu.memory_space<vmem>>, vector<128x128xbf16>
    %c6 = arith.constant 6 : index
    %c0_30 = arith.constant 0 : index
    %74 = vector.load %arg5[%c6, %c0_30] : memref<8x128xf32, #tpu.memory_space<vmem>>, vector<1x128xf32>
    %75 = arith.truncf %72 : vector<8x128xf32> to vector<8x128xbf16>
    %cst_31 = arith.constant dense<0.000000e+00> : vector<8x128xf32>
    %76 = tpu.matmul %75, %73, %cst_31 {dimension_numbers = #tpu.dot_dimension_numbers<[1], [0], [0], [1], [0, 0, 1, 1], [], []>} : vector<8x128xbf16>, vector<128x128xbf16>, vector<8x128xf32> -> vector<8x128xf32>
    %77 = vector.broadcast %74 : vector<1x128xf32> to vector<8x128xf32>
    %78 = arith.addf %76, %77 : vector<8x128xf32>
    %cst_32 = arith.constant 0.000000e+00 : f32
    %79 = vector.broadcast %cst_32 : f32 to vector<8x128xf32>
    %80 = arith.maximumf %78, %79 : vector<8x128xf32>
    %c0_33 = arith.constant 0 : index
    %c0_34 = arith.constant 0 : index
    %81 = vector.load %arg6[%c0_33, %c0_34] : memref<8x128xf32, #tpu.memory_space<vmem>>, vector<8x128xf32>
    tpu.vector_store %arg6[%c0_33, %c0_34], %80 {strides = array<i32>} : memref<8x128xf32, #tpu.memory_space<vmem>>, vector<8x128xf32>,
    return
  }
  func.func @transform_0(%arg0: i32) -> (i32, i32) {
    %c0_i32 = arith.constant 0 : i32
    %c0_i32_0 = arith.constant 0 : i32
    return %arg0, %c0_i32 : i32, i32
  }
  func.func @transform_1(%arg0: i32) -> (i32, i32) {
    %c0_i32 = arith.constant 0 : i32
    %c0_i32_0 = arith.constant 0 : i32
    return %arg0, %c0_i32 : i32, i32
  }
  func.func @transform_2(%arg0: i32) -> (i32, i32) {
    %c0_i32 = arith.constant 0 : i32
    %c0_i32_0 = arith.constant 0 : i32
    %c0_i32_1 = arith.constant 0 : i32
    return %c0_i32, %c0_i32_0 : i32, i32
  }
  func.func @transform_3(%arg0: i32) -> (i32, i32) {
    %c0_i32 = arith.constant 0 : i32
    %c0_i32_0 = arith.constant 0 : i32
    %c0_i32_1 = arith.constant 0 : i32
    return %c0_i32, %c0_i32_0 : i32, i32
  }
  func.func @transform_4(%arg0: i32) -> (i32, i32) {
    %c0_i32 = arith.constant 0 : i32
    %c0_i32_0 = arith.constant 0 : i32
    %c0_i32_1 = arith.constant 0 : i32
    return %c0_i32, %c0_i32_0 : i32, i32
  }
  func.func @transform_5(%arg0: i32) -> (i32, i32) {
    %c0_i32 = arith.constant 0 : i32
    %c0_i32_0 = arith.constant 0 : i32
    return %arg0, %c0_i32 : i32, i32
  }
}

</mosaic_0001>

<bundles_post_ra>
// kernel: tpu_custom_call.1
= control target key start
LH: loop header
LB: loop body
LE: loop exit
PB: predicated region body
PF: predicated region fallthrough
CT: control target
= control target key end

     0   :  { %10 = vsyncpa [#allocation3], 0  ;;  %s1594_s0 = inlined_call_operand.vmem [shape: f32[8,16], index: 0, kind: input, shape index: {}]   ;;  %s1595_s1 = inlined_call_operand.vmem [shape: f32[8,1], index: 1, kind: input, shape index: {}]   ;;  %s1596_s2 = inlined_call_operand.hbm [shape: f32[1,128], index: 2, kind: input, shape index: {}]   ;;  %s1597_s3 = inlined_call_operand.hbm [shape: bf16[896,128], index: 3, kind: input, shape index: {}]   ;;  %s1598_s4 = inlined_call_operand.vmem [shape: f32[8,128], index: 4, kind: input, shape index: {}]   ;;  %s1599_s5 = inlined_call_operand.hbm [shape: f32[8,128], index: 5, kind: output, shape index: {}]  }
   0x1   :  { %11 = vsyncpa [#allocation6], 0 }
   0x2   :  { %12 = vsyncpa [#allocation4], 0  ;;  %s1429_s18 = smov [#allocation2]   ;;  %s1430_s20 = smov [#allocation5]  }
   0x3   :  { %s23_s19 = sshll.u32 %s1429_s18, 4  ;;  %s32_s21 = sshll.u32 %s1430_s20, 4  ;;  %s24_s19 = int_to_ptr.vmem [resolvable:$true] %s23_s19  ;;  %s33_s21 = int_to_ptr.vmem [resolvable:$true] %s32_s21 }
   0x4   :  { %s1371_s22 = scalar_lea.vmem %s24_s19, 16  ;;  %s1375_s23 = scalar_lea.vmem %s24_s19, 32 }
   0x5   :  { %p1372_p0 = scmp.ne.s32.totalorder %s24_s19, %s1371_s22  ;;  %p1376_p1 = scmp.lt.s32.totalorder %s24_s19, %s24_s19 }
   0x6   :  { %p1377_p2 = scmp.lt.s32.totalorder %s1375_s23, %s1371_s22 }
   0x8   :  { %p1378_p3 = por %p1377_p2, %p1376_p1 }
   0xa   :  { %p1379_p4 = pnand %p1378_p3, %p1372_p0 }
   0xc   :  { %1382 = shalt.err (!%p1379_p4)
}
   0xd   :  { %26 = dma.hbm_to_vmem [thread:$0]  %s1596_s2, 16, %s24_s19, [#allocation3]  }
   0xe   :  { %s1391_s26 = scalar_lea.vmem %s33_s21, 7168  ;;  %p1396_p6 = scmp.lt.s32.totalorder %s33_s21, %s33_s21 }
   0xf   :  { %p1392_p5 = scmp.ne.s32.totalorder %s33_s21, %s1391_s26  ;;  %p1397_p7 = scmp.lt.s32.totalorder %s1391_s26, %s1391_s26 }
  0x11   :  { %p1398_p8 = por %p1397_p7, %p1396_p6 }
  0x13   :  { %p1399_p9 = pnand %p1398_p8, %p1392_p5 }
  0x15   :  { %1402 = shalt.err (!%p1399_p9)
}
  0x16   :  { %s1431_s27 = smov 64   ;;  %s1432_s28 = smov 4  }
  0x17   :  { %38 = dma.hbm_to_vmem [thread:$0]  %s1597_s3, 7168, %s33_s21, [#allocation6], %s1431_s27, %s1431_s27, %s1432_s28  }
  0x18   :  { %1423 = dma.done.wait [#allocation3], 16  }
  0x19   :  { %1424 = vsyncadd [#allocation3], 4294967280 }
  0x1a   :  { %1425 = dma.done.wait [#allocation6], 7168  }
  0x1b   :  { %1426 = vsyncadd [#allocation6], 4294960128  ;;  %v1433_v0 = vmov 0   ;;  %v48_v1 = vld [vmem:[%s1595_s1] sm:$0xff]  ;;  %v1434_v3 = vmov 0.0   ;;  %v1303_v4 = vld [vmem:[#allocation5 + $0x30] sm:$0xff]  }
  0x1c   :  { %1301 = vset.pattern.permute.xlu0 %v1433_v0  ;;  %v1302_v2 = vld [vmem:[#allocation5 + $0x38] sm:$0xff]   ;;  %1157 = vmatprep.subr.bf16.mxu0 %v1434_v3  ;;  %v1304_v5 = vld [vmem:[#allocation5 + $0x28] sm:$0xff]   ;;  %v1305_v6 = vld [vmem:[#allocation5 + $0x20] sm:$0xff]   ;;  %vm1435_vm0 = vmmov 0   ;;  %v1436_v24 = vmov 683565275  }
  0x1d   :  { %52 = vperm.xlu0 %1301, %v48_v1   ;;  %1177 = vmatprep.subr.bf16.mxu1 %v1434_v3  ;;  %v1306_v7 = vld [vmem:[#allocation5 + $0x18] sm:$0xff]   ;;  %v1307_v8 = vld [vmem:[#allocation5 + $0x10] sm:$0xff]   ;;  %v1308_v9 = vld [vmem:[#allocation5 + $0x8] sm:$0xff]   ;;  %v1437_v26 = vmov 2475754826   ;;  %s1442_s20 = smov [#allocation7]  }
  0x1e   :  { %1158 = vmatpush3.bf16.msra.mxu0 %v1302_v2  ;;  %1173 = vmatprep.mubr.msk.bf16.mxu0 %vm1435_vm0, %v1434_v3  ;;  %v1309_v10 = vld [vmem:[#allocation5] sm:$0xff]   ;;  %v1033_v11 = vld [vmem:[#allocation2] ss:$0 sm:$0xff]  ;;  %v1438_v29 = vmov 2131351028   ;;  %s1023_s21 = sshll.u32 %s1442_s20, 4  ;;  %s1024_s21 = int_to_ptr.vmem [resolvable:$true] %s1023_s21 }
  0x1f   :  { %1159 = vmatprep.subr.bf16.mxu0 %v1434_v3  ;;  %1193 = vmatprep.mubr.msk.bf16.mxu1 %vm1435_vm0, %v1434_v3  ;;  %v1439_v32 = vmov 2102212464   ;;  %v1440_v35 = vmov 920167782   ;;  %v1441_v38 = vmov 1326507024   ;;  %p1408_p11 = scmp.lt.s32.totalorder %s1024_s21, %s1024_s21 }
  0x20   :  { %s1403_s22 = scalar_lea.vmem %s1024_s21, 128 }
  0x21   :  { %p1404_p10 = scmp.ne.s32.totalorder %s1024_s21, %s1403_s22  ;;  %p1409_p12 = scmp.lt.s32.totalorder %s1403_s22, %s1403_s22 }
  0x22   :  { %1160 = vmatpush3.bf16.msra.mxu0 %v1303_v4 }
  0x23   :  { %1161 = vmatprep.subr.bf16.mxu0 %v1434_v3  ;;  %p1410_p13 = por %p1409_p12, %p1408_p11 }
  0x25   :  { %p1411_p0 = pnand %p1410_p13, %p1404_p10 }
  0x26   :  { %1162 = vmatpush3.bf16.msra.mxu0 %v1304_v5 }
  0x27   :  { %1163 = vmatprep.subr.bf16.mxu0 %v1434_v3 }
  0x2a   :  { %1164 = vmatpush3.bf16.msra.mxu0 %v1305_v6 }
  0x2b   :  { %1165 = vmatprep.subr.bf16.mxu0 %v1434_v3 }
  0x2e   :  { %1166 = vmatpush3.bf16.msra.mxu0 %v1306_v7 }
  0x2f   :  { %1167 = vmatprep.subr.bf16.mxu0 %v1434_v3 }
  0x32   :  { %1168 = vmatpush3.bf16.msra.mxu0 %v1307_v8 }
  0x33   :  { %1169 = vmatprep.subr.bf16.mxu0 %v1434_v3 }
  0x36   :  { %1170 = vmatpush3.bf16.msra.mxu0 %v1308_v9 }
  0x37   :  { %1171 = vmatprep.subr.bf16.mxu0 %v1434_v3 }
  0x3a   :  { %1172 = vmatpush3.bf16.msra.mxu0 %v1309_v10 }
  0x3b   :  { %1197 = vmatprep.subr.bf16.mxu0 %v1434_v3 }
  0x98   :  { %v53_v12 = vpop.permute.xlu0 %52 }
  0x99   :  { %v1496_v13 = vmul.f32 %v1033_v11, %v53_v12 }
  0x9b   :  { %v68_v14 = vand.u32 2139095040, %v1496_v13  ;;  %v65_v18 = vand.u32 2147483647, %v1496_v13  ;;  %vm67_vm8 = vcmp.lt.s32.totalorder %v1496_v13, 0 }
  0x9d   :  { %v69_v15 = vshrl.u32 %v68_v14, 23  ;;  %v72_v21 = vand.u32 8388607, %v65_v18  ;;  %vm66_vm9 = vcmp.le.f32.partialorder %v65_v18, 0.7853982 }
  0x9f   :  { %v1034_v16 = vadd.s32 4294967169, %v69_v15  ;;  %v73_v40 = vor.u32 8388608, %v72_v21 }
  0xa1   :  { %v75_v17 = vadd.s32 1, %v1034_v16  ;;  %v113_v54 = vshll.u32 %v73_v40, 8 }
  0xa3   :  { %vm76_vm1 = vcmp.gt.s32.totalorder %v75_v17, 0 }
  0xa4   :  { %v77_v19 = vsel %vm76_vm1, %v75_v17, 0 }
  0xa5   :  { %v79_v20 = vand.u32 31, %v77_v19  ;;  %v78_v23 = vshrl.u32 %v77_v19, 5 }
  0xa7   :  { %v80_v22 = vsub.s32 32, %v79_v20  ;;  %v82_v25 = vshll.u32 %v1436_v24, %v79_v20  ;;  %v85_v27 = vshll.u32 %v1437_v26, %v79_v20  ;;  %v88_v31 = vshll.u32 %v1438_v29, %v79_v20 }
  0xa8   :  { %v91_v34 = vshll.u32 %v1439_v32, %v79_v20  ;;  %v94_v37 = vshll.u32 %v1440_v35, %v79_v20  ;;  %vm97_vm2 = vcmp.lt.s32.totalorder %v78_v23, 1  ;;  %vm100_vm3 = vcmp.lt.s32.totalorder %v78_v23, 4 }
  0xa9   :  { %v83_v28 = vshrl.u32 %v1437_v26, %v80_v22  ;;  %v86_v30 = vshrl.u32 %v1438_v29, %v80_v22  ;;  %v89_v33 = vshrl.u32 %v1439_v32, %v80_v22  ;;  %v92_v36 = vshrl.u32 %v1440_v35, %v80_v22 }
  0xaa   :  { %v95_v39 = vshrl.u32 %v1441_v38, %v80_v22  ;;  %v81_v49 = vshrl.u32 %v1436_v24, %v80_v22  ;;  %vm99_vm4 = vcmp.lt.s32.totalorder %v78_v23, 3  ;;  %vm98_vm5 = vcmp.lt.s32.totalorder %v78_v23, 2 }
  0xab   :  { %v84_v41 = vor.u32 %v83_v28, %v82_v25  ;;  %v87_v42 = vor.u32 %v86_v30, %v85_v27  ;;  %v90_v43 = vor.u32 %v89_v33, %v88_v31  ;;  %v93_v44 = vor.u32 %v92_v36, %v91_v34 }
  0xac   :  { %v96_v45 = vor.u32 %v95_v39, %v94_v37  ;;  %v62_v34 = vlaneseq }
  0xad   :  { %v102_v46 = vsel %vm100_vm3, %v90_v43, 2102212464  ;;  %v105_v47 = vsel %vm97_vm2, %v84_v41, %v87_v42  ;;  %v109_v48 = vsel %vm97_vm2, %v87_v42, %v90_v43  ;;  %v106_v50 = vsel %vm100_vm3, %v93_v44, 920167782 }
  0xae   :  { %v110_v51 = vsel %vm100_vm3, %v96_v45, 1326507024  ;;  %v107_v52 = vsel %vm99_vm4, %v90_v43, %v106_v50  ;;  %v101_v55 = vsel %vm97_vm2, %v81_v49, %v84_v41  ;;  %v103_v56 = vsel %vm99_vm4, %v87_v42, %v102_v46 }
  0xaf   :  { %v111_v53 = vsel %vm99_vm4, %v93_v44, %v110_v51  ;;  %v108_v57 = vsel %vm98_vm5, %v105_v47, %v107_v52  ;;  %v104_v63 = vsel %vm98_vm5, %v101_v55, %v103_v56  ;;  %v63_v36 = vand.u32 127, %v62_v34  ;;  %v1310_v52 = vld [vmem:[#allocation5 + $0x80] sm:$0xff]   ;;  %v1311_v55 = vld [vmem:[#allocation5 + $0x78] sm:$0xff]   ;;  %v1312_v56 = vld [vmem:[#allocation5 + $0x70] sm:$0xff]  }
  0xb0   :  { %v112_v58 = vsel %vm98_vm5, %v109_v48, %v111_v53  ;;  %v1505_v61 = vmul.u32.u64.low %v113_v54, %v108_v57  ;;  %v1506_v62 = vmul.u32.u64.high %v113_v54, %v108_v57, %v1505_v61  ;;  %v120_v1 = vmul.u32 %v113_v54, %v104_v63  ;;  %1178 = vmatpush3.bf16.msra.mxu1 %v1311_v55  ;;  %v1313_v57 = vld [vmem:[#allocation5 + $0x68] sm:$0xff]   ;;  %v1042_v63 = vld [vmem:[%s1598_s4] ss:$0 sm:$0xff] }
  0xb1   :  { %v1502_v59 = vmul.u32.u64.low %v113_v54, %v112_v58  ;;  %v1503_v60 = vmul.u32.u64.high %v113_v54, %v112_v58, %v1502_v59  ;;  %vm168_vm11 = vcmp.lt.s32.totalorder %v63_v36, 64  ;;  %vm64_vm2 = vcmp.lt.s32.totalorder %v63_v36, 32  ;;  %v506_v54 = vld [vmem:[%s1594_s0] sm:$0xff]  ;;  %1179 = vmatprep.subr.bf16.mxu1 %v1434_v3  ;;  %v1329_v36 = vld [vmem:[#allocation5 + $0x128] sm:$0xff]  }
  0xb2   :  { %v123_v0 = vadd.s32 1, %v1506_v62  ;;  %vm157_vm3 = vweird.f32 %v1496_v13  ;;  %vm521_vm4 = vcmask 130048   ;;  %v1314_v58 = vld [vmem:[#allocation5 + $0x60] sm:$0xff]   ;;  %v1315_v59 = vld [vmem:[#allocation5 + $0x58] sm:$0xff]  }
  0xb3   :  { %vm122_vm6 = vc.u32 %v1503_v60, %v1505_v61  ;;  %v121_v15 = vadd.s32 %v1505_v61, %v1503_v60  ;;  %v1316_v60 = vld [vmem:[#allocation5 + $0x50] sm:$0xff]   ;;  %v1317_v61 = vld [vmem:[#allocation5 + $0x48] sm:$0xff]   ;;  %v1327_v34 = vld [vmem:[#allocation5 + $0x138] sm:$0xff]  }
  0xb4   :  { %v124_v2 = vsel %vm122_vm6, %v123_v0, %v1506_v62  ;;  %1180 = vmatpush3.bf16.msra.mxu1 %v1312_v56  ;;  %v1318_v62 = vld [vmem:[#allocation5 + $0x40] sm:$0xff]  }
  0xb5   :  { %v125_v4 = vadd.s32 %v124_v2, %v120_v1  ;;  %1181 = vmatprep.subr.bf16.mxu1 %v1434_v3 }
  0xb7   :  { %v126_v5 = vadd.s32 536870912, %v125_v4 }
  0xb8   :  { %1182 = vmatpush3.bf16.msra.mxu1 %v1313_v57 }
  0xb9   :  { %v127_v6 = vshrl.u32 %v126_v5, 30  ;;  %1183 = vmatprep.subr.bf16.mxu1 %v1434_v3 }
  0xbb   :  { %v128_v7 = vshll.u32 %v127_v6, 30  ;;  %v151_v29 = vsub.s32 4, %v127_v6 }
  0xbc   :  { %1184 = vmatpush3.bf16.msra.mxu1 %v1314_v58 }
  0xbd   :  { %v129_v8 = vsub.s32 %v125_v4, %v128_v7  ;;  %v152_v32 = vsel %vm67_vm8, %v151_v29, %v127_v6  ;;  %1185 = vmatprep.subr.bf16.mxu1 %v1434_v3  ;;  %v1325_v29 = vld [vmem:[#allocation5 + $0xc8] sm:$0xff]  }
  0xbe   :  { %v154_v33 = vsel %vm66_vm9, 0, %v152_v32 }
  0xbf   :  { %v131_v9 = vsub.s32 0, %v129_v8  ;;  %v262_v35 = vadd.s32 3, %v154_v33  ;;  %v158_v37 = vand.u32 3, %v154_v33 }
  0xc0   :  { %1186 = vmatpush3.bf16.msra.mxu1 %v1315_v59 }
  0xc1   :  { %v1035_v10 = vmin.u32 %v131_v9, %v129_v8  ;;  %v263_v38 = vand.u32 3, %v262_v35  ;;  %vm163_vm10 = vcmp.eq.s32.totalorder %v158_v37, 2  ;;  %vm160_vm13 = vcmp.eq.s32.totalorder %v158_v37, 0  ;;  %1187 = vmatprep.subr.bf16.mxu1 %v1434_v3  ;;  %v1328_v35 = vld [vmem:[#allocation5 + $0x130] sm:$0xff]  }
  0xc2   :  { %vm159_vm15 = vcmp.lt.s32.totalorder %v158_v37, 2  ;;  %v1330_v37 = vld [vmem:[#allocation5 + $0x120] sm:$0xff]  }
  0xc3   :  { %v133_v11 = vclz %v1035_v10  ;;  %vm268_vm12 = vcmp.eq.s32.totalorder %v263_v38, 2  ;;  %vm265_vm14 = vcmp.eq.s32.totalorder %v263_v38, 0  ;;  %vm264_vm1 = vcmp.lt.s32.totalorder %v263_v38, 2  ;;  %v1331_v38 = vld [vmem:[#allocation5 + $0x118] sm:$0xff]  }
  0xc4   :  { %1188 = vmatpush3.bf16.msra.mxu1 %v1316_v60  ;;  %v1341_v60 = vld [vmem:[#allocation5 + $0x148] sm:$0xff]  }
  0xc5   :  { %v1036_v12 = vadd.s32 4294967294, %v133_v11  ;;  %1189 = vmatprep.subr.bf16.mxu1 %v1434_v3 }
  0xc7   :  { %vm1037_vm7 = vcmp.lt.s32.totalorder %v1036_v12, 0 }
  0xc8   :  { %v136_v14 = vsel %vm1037_vm7, 0, %v1036_v12  ;;  %1190 = vmatpush3.bf16.msra.mxu1 %v1317_v61  ;;  %v1061_v12 = vld [vmem:[%s1598_s4 + $0x2] ss:$0 sm:$0xff] }
  0xc9   :  { %v137_v16 = vsub.s32 32, %v136_v14  ;;  %v141_v17 = vsub.s32 4294967266, %v136_v14  ;;  %v138_v19 = vshll.u32 %v129_v8, %v136_v14  ;;  %1191 = vmatprep.subr.bf16.mxu1 %v1434_v3  ;;  %v1342_v61 = vld [vmem:[#allocation5 + $0x140] sm:$0xff]  }
  0xcb   :  { %v139_v20 = vshrl.u32 %v121_v15, %v137_v16  ;;  %v142_v21 = vadd.s32 127, %v141_v17 }
  0xcc   :  { %1192 = vmatpush3.bf16.msra.mxu1 %v1318_v62  ;;  %v1343_v62 = vld [vmem:[#allocation5 + $0x1b8] sm:$0xff]  }
  0xcd   :  { %v140_v22 = vor.u32 %v139_v20, %v138_v19  ;;  %v143_v23 = vshll.u32 %v142_v21, 23  ;;  %1203 = vmatprep.subr.bf16.mxu1 %v1434_v3  ;;  %v1319_v20 = vld [vmem:[#allocation5 + $0xf8] sm:$0xff]  }
  0xcf   :  { %v144_v24 = vor.u32 4788187, %v143_v23  ;;  %v147_v26 = vcvt.s32.f32 %v140_v22  ;;  %v1320_v22 = vld [vmem:[#allocation5 + $0xf0] sm:$0xff]  }
  0xd1   :  { %v145_v25 = vand.u32 2147483647, %v144_v24  ;;  %v1321_v24 = vld [vmem:[#allocation5 + $0xe8] sm:$0xff]  }
  0xd3   :  { %v148_v27 = vmul.f32 %v147_v26, %v145_v25  ;;  %v1322_v26 = vld [vmem:[#allocation5 + $0xe0] sm:$0xff]  }
  0xd5   :  { %v149_v28 = vxor.u32 2147483648, %v148_v27 }
  0xd7   :  { %v150_v30 = vsel %vm67_vm8, %v149_v28, %v148_v27  ;;  %v1323_v27 = vld [vmem:[#allocation5 + $0xd8] sm:$0xff]   ;;  %v1324_v28 = vld [vmem:[#allocation5 + $0xd0] sm:$0xff]  }
  0xd8   :  { %v153_v31 = vsel %vm66_vm9, %v1496_v13, %v150_v30  ;;  %v510_v13 = vpack.c.bf16 %v506_v54, %v506_v54 }
  0xd9   :  { %1351 = vcosq.f32 %v153_v31 }
  0xda   :  { %1353 = vsinq.f32 %v153_v31  ;;  %v1326_v31 = vld [vmem:[#allocation5 + $0xc0] sm:$0xff]  }
  0xe6   :  { %v1352_v39 = vpop.eup %1351 }
  0xe7   :  { %v1354_v40 = vpop.eup %1353  ;;  %v164_v41 = vxor.u32 2147483648, %v1352_v39 }
  0xe8   :  { %v161_v42 = vxor.u32 2147483648, %v1354_v40 }
  0xe9   :  { %v165_v18 = vsel %vm163_vm10, %v164_v41, %v1354_v40  ;;  %v270_v43 = vsel %vm268_vm12, %v164_v41, %v1354_v40  ;;  %v1333_v40 = vld [vmem:[#allocation5 + $0x108] sm:$0xff]   ;;  %v1334_v41 = vld [vmem:[#allocation5 + $0x100] sm:$0xff]  }
  0xea   :  { %v162_v44 = vsel %vm160_vm13, %v1352_v39, %v161_v42  ;;  %v267_v45 = vsel %vm265_vm14, %v1352_v39, %v161_v42  ;;  %v1332_v39 = vld [vmem:[#allocation5 + $0x110] sm:$0xff]   ;;  %v1335_v42 = vld [vmem:[#allocation5 + $0x178] sm:$0xff]  }
  0xeb   :  { %v166_v46 = vsel %vm159_vm15, %v162_v44, %v165_v18  ;;  %v271_v47 = vsel %vm264_vm1, %v267_v45, %v270_v43  ;;  %v1336_v18 = vld [vmem:[#allocation5 + $0x170] sm:$0xff]   ;;  %v1337_v43 = vld [vmem:[#allocation5 + $0x168] sm:$0xff]   ;;  %v1338_v44 = vld [vmem:[#allocation5 + $0x160] sm:$0xff]  }
  0xec   :  { %v167_v48 = vsel %vm157_vm3, nan, %v166_v46  ;;  %v272_v49 = vsel %vm157_vm3, nan, %v271_v47  ;;  %v1339_v45 = vld [vmem:[#allocation5 + $0x158] sm:$0xff]   ;;  %v1340_v46 = vld [vmem:[#allocation5 + $0x150] sm:$0xff]  }
  0xed   :  { %v275_v50 = vsel %vm168_vm11, %v272_v49, 0.0 }
  0xee   :  { %v278_v51 = vsel %vm64_vm2, %v167_v48, %v275_v50 }
  0xef   :  { %v296_v53 = vpack.c.bf16 %v278_v51, %v278_v51  ;;  %v1052_v51 = vld [vmem:[%s1598_s4 + $0x1] ss:$0 sm:$0xff] }
  0xf1   :  { %1174 = vmatmul.mubr.bf16.vlgmr.msra.gmra.mxu0 %v296_v53 }
  0xf2   :  { %1198 = vmatpush3.bf16.msra.mxu0 %v1310_v52  ;;  %1199 = vmatprep.mubr.msk.bf16.mxu0 %vm1435_vm0, %v1434_v3  ;;  %v1065_v52 = vld [vmem:[%s1598_s4 + $0x3] ss:$0 sm:$0xff] }
  0xf3   :  { %1223 = vmatprep.subr.bf16.mxu0 %v1434_v3 }
  0xf9   :  { %1200 = vmatmul.mubr.msk.bf16.vlgmr.msra.gmra.mxu0 %vm521_vm4, %v510_v13 }
  0xfa   :  { %1239 = vmatprep.mubr.msk.bf16.mxu0 %vm1435_vm0, %v1434_v3  ;;  %1224 = vmatpush3.bf16.msra.mxu0 %v1327_v34 }
  0xfb   :  { %1225 = vmatprep.subr.bf16.mxu0 %v1434_v3 }
  0xfe   :  { %1226 = vmatpush3.bf16.msra.mxu0 %v1328_v35 }
  0xff   :  { %1227 = vmatprep.subr.bf16.mxu0 %v1434_v3 }
 0x102   :  { %1228 = vmatpush3.bf16.msra.mxu0 %v1329_v36 }
 0x103   :  { %1229 = vmatprep.subr.bf16.mxu0 %v1434_v3 }
 0x106   :  { %1230 = vmatpush3.bf16.msra.mxu0 %v1330_v37 }
 0x107   :  { %1231 = vmatprep.subr.bf16.mxu0 %v1434_v3 }
 0x10a   :  { %1232 = vmatpush3.bf16.msra.mxu0 %v1331_v38 }
 0x10b   :  { %1233 = vmatprep.subr.bf16.mxu0 %v1434_v3 }
 0x10e   :  { %1234 = vmatpush3.bf16.msra.mxu0 %v1332_v39 }
 0x10f   :  { %1235 = vmatprep.subr.bf16.mxu0 %v1434_v3 }
 0x112   :  { %1236 = vmatpush3.bf16.msra.mxu0 %v1333_v40 }
 0x113   :  { %1237 = vmatprep.subr.bf16.mxu0 %v1434_v3 }
 0x116   :  { %1238 = vmatpush3.bf16.msra.mxu0 %v1334_v41 }
 0x117   :  { %1263 = vmatprep.subr.bf16.mxu0 %v1434_v3 }
 0x1b1   :  { %v383_v0 = vpop.f32.mrf.mxu0 }
 0x1b2   :  { %v384_v1 = vadd.f32 %v1042_v63, %v383_v0  ;;  %v1344_v63 = vld [vmem:[#allocation5 + $0x1b0] sm:$0xff]   ;;  %v1345_v0 = vld [vmem:[#allocation5 + $0x1a8] sm:$0xff]  }
 0x1b3   :  { %v1175_v2 = vpop.f32.mrf.mxu0 }
 0x1b4   :  { %v1051_v4 = vmul.f32 -1.442695, %v384_v1  ;;  %v1347_v2 = vld [vmem:[#allocation5 + $0x198] sm:$0xff]  }
 0x1b5   :  { %v386_v5 = vpop.f32.mrf.mxu0 }
 0x1b6   :  { %1355 = vpow2.f32 %v1051_v4  ;;  %v1348_v4 = vld [vmem:[#allocation5 + $0x190] sm:$0xff]   ;;  %v1074_v5 = vld [vmem:[%s1598_s4 + $0x4] ss:$0 sm:$0xff] }
 0x1b7   :  { %v1176_v6 = vpop.f32.mrf.mxu0 }
 0x1b9   :  { %v559_v7 = vpop.f32.mrf.mxu0 }
 0x1ba   :  { %v560_v15 = vadd.f32 %v1061_v12, %v559_v7 }
 0x1bb   :  { %v1201_v8 = vpop.f32.mrf.mxu0 }
 0x1bc   :  { %v1064_v16 = vmul.f32 -1.442695, %v560_v15 }
 0x1bd   :  { %v562_v9 = vpop.f32.mrf.mxu0 }
 0x1bf   :  { %v1202_v10 = vpop.f32.mrf.mxu0 }
 0x1c3   :  { %v1356_v11 = vpop.eup %1355 }
 0x1c4   :  { %v392_v14 = vadd.f32 1.0, %v1356_v11 }
 0x1c6   :  { %1357 = vrcp.f32 %v392_v14  ;;  %v1349_v14 = vld [vmem:[#allocation5 + $0x188] sm:$0xff]  }
 0x1c7   :  { %1359 = vpow2.f32 %v1064_v16  ;;  %v1083_v16 = vld [vmem:[%s1598_s4 + $0x5] ss:$0 sm:$0xff] }
 0x1d3   :  { %v1358_v17 = vpop.eup %1357 }
 0x1d4   :  { %v395_v19 = vmul.f32 %v1358_v17, %v384_v1  ;;  %v1360_v23 = vpop.eup %1359  ;;  %v1346_v1 = vld [vmem:[#allocation5 + $0x1a0] sm:$0xff]  }
 0x1d5   :  { %v568_v25 = vadd.f32 1.0, %v1360_v23 }
 0x1d6   :  { %v413_v21 = vpack.c.bf16 %v395_v19, %v395_v19 }
 0x1d7   :  { %1361 = vrcp.f32 %v568_v25  ;;  %v1092_v25 = vld [vmem:[%s1598_s4 + $0x6] ss:$0 sm:$0xff] }
 0x1d8   :  { %1194 = vmatmul.mubr.bf16.vlgmr.msra.gmra.mxu1 %v413_v21 }
 0x1d9   :  { %1204 = vmatpush3.bf16.msra.mxu1 %v1319_v20  ;;  %1219 = vmatprep.mubr.msk.bf16.mxu1 %vm1435_vm0, %v1434_v3 }
 0x1da   :  { %1205 = vmatprep.subr.bf16.mxu1 %v1434_v3 }
 0x1dd   :  { %1206 = vmatpush3.bf16.msra.mxu1 %v1320_v22 }
 0x1de   :  { %1207 = vmatprep.subr.bf16.mxu1 %v1434_v3 }
 0x1e1   :  { %1208 = vmatpush3.bf16.msra.mxu1 %v1321_v24 }
 0x1e2   :  { %1209 = vmatprep.subr.bf16.mxu1 %v1434_v3 }
 0x1e4   :  { %v1362_v30 = vpop.eup %1361 }
 0x1e5   :  { %1210 = vmatpush3.bf16.msra.mxu1 %v1322_v26  ;;  %v571_v32 = vmul.f32 %v1362_v30, %v560_v15  ;;  %v1350_v15 = vld [vmem:[#allocation5 + $0x180] sm:$0xff]  }
 0x1e6   :  { %1211 = vmatprep.subr.bf16.mxu1 %v1434_v3 }
 0x1e7   :  { %v589_v33 = vpack.c.bf16 %v571_v32, %v571_v32 }
 0x1e9   :  { %1212 = vmatpush3.bf16.msra.mxu1 %v1323_v27 }
 0x1ea   :  { %1213 = vmatprep.subr.bf16.mxu1 %v1434_v3 }
 0x1ed   :  { %1214 = vmatpush3.bf16.msra.mxu1 %v1324_v28 }
 0x1ee   :  { %1215 = vmatprep.subr.bf16.mxu1 %v1434_v3 }
 0x1f1   :  { %1216 = vmatpush3.bf16.msra.mxu1 %v1325_v29 }
 0x1f2   :  { %1217 = vmatprep.subr.bf16.mxu1 %v1434_v3 }
 0x1f5   :  { %1218 = vmatpush3.bf16.msra.mxu1 %v1326_v31 }
 0x1f6   :  { %1243 = vmatprep.subr.bf16.mxu1 %v1434_v3 }
 0x1f8   :  { %1220 = vmatmul.mubr.bf16.vlgmr.msra.gmra.mxu1 %v589_v33 }
 0x1f9   :  { %1259 = vmatprep.mubr.msk.bf16.mxu1 %vm1435_vm0, %v1434_v3  ;;  %1244 = vmatpush3.bf16.msra.mxu1 %v1335_v42 }
 0x1fa   :  { %1245 = vmatprep.subr.bf16.mxu1 %v1434_v3 }
 0x1fd   :  { %1246 = vmatpush3.bf16.msra.mxu1 %v1336_v18 }
 0x1fe   :  { %1247 = vmatprep.subr.bf16.mxu1 %v1434_v3 }
 0x201   :  { %1248 = vmatpush3.bf16.msra.mxu1 %v1337_v43 }
 0x202   :  { %1249 = vmatprep.subr.bf16.mxu1 %v1434_v3 }
 0x205   :  { %1250 = vmatpush3.bf16.msra.mxu1 %v1338_v44 }
 0x206   :  { %1251 = vmatprep.subr.bf16.mxu1 %v1434_v3 }
 0x209   :  { %1252 = vmatpush3.bf16.msra.mxu1 %v1339_v45 }
 0x20a   :  { %1253 = vmatprep.subr.bf16.mxu1 %v1434_v3 }
 0x20d   :  { %1254 = vmatpush3.bf16.msra.mxu1 %v1340_v46 }
 0x20e   :  { %1255 = vmatprep.subr.bf16.mxu1 %v1434_v3 }
 0x211   :  { %1256 = vmatpush3.bf16.msra.mxu1 %v1341_v60 }
 0x212   :  { %1257 = vmatprep.subr.bf16.mxu1 %v1434_v3 }
 0x215   :  { %1258 = vmatpush3.bf16.msra.mxu1 %v1342_v61 }
 0x298   :  { %v500_v47 = vpop.f32.mrf.mxu1 }
 0x299   :  { %v501_v54 = vadd.f32 %v1052_v51, %v500_v47 }
 0x29a   :  { %v1195_v48 = vpop.f32.mrf.mxu1 }
 0x29c   :  { %v503_v49 = vpop.f32.mrf.mxu1 }
 0x29e   :  { %v1196_v50 = vpop.f32.mrf.mxu1 }
 0x2b8   :  { %v676_v53 = vpop.f32.mrf.mxu1 }
 0x2b9   :  { %v677_v13 = vadd.f32 %v1065_v52, %v676_v53 }
 0x2ba   :  { %v1221_v55 = vpop.f32.mrf.mxu1 }
 0x2bb   :  { %v682_v56 = vadd.f32 %v677_v13, %v501_v54 }
 0x2bc   :  { %v679_v57 = vpop.f32.mrf.mxu1 }
 0x2bd   :  { %v700_v58 = vpack.c.bf16 %v682_v56, %v682_v56 }
 0x2be   :  { %v1222_v59 = vpop.f32.mrf.mxu1 }
 0x2bf   :  { %1240 = vmatmul.mubr.bf16.vlgmr.msra.gmra.mxu0 %v700_v58 }
 0x2c0   :  { %1279 = vmatprep.mubr.msk.bf16.mxu0 %vm1435_vm0, %v1434_v3  ;;  %1264 = vmatpush3.bf16.msra.mxu0 %v1343_v62 }
 0x2c1   :  { %1265 = vmatprep.subr.bf16.mxu0 %v1434_v3 }
 0x2c4   :  { %1266 = vmatpush3.bf16.msra.mxu0 %v1344_v63 }
 0x2c5   :  { %1267 = vmatprep.subr.bf16.mxu0 %v1434_v3 }
 0x2c8   :  { %1268 = vmatpush3.bf16.msra.mxu0 %v1345_v0 }
 0x2c9   :  { %1269 = vmatprep.subr.bf16.mxu0 %v1434_v3 }
 0x2cc   :  { %1270 = vmatpush3.bf16.msra.mxu0 %v1346_v1 }
 0x2cd   :  { %1271 = vmatprep.subr.bf16.mxu0 %v1434_v3 }
 0x2d0   :  { %1272 = vmatpush3.bf16.msra.mxu0 %v1347_v2 }
 0x2d1   :  { %1273 = vmatprep.subr.bf16.mxu0 %v1434_v3 }
 0x2d4   :  { %1274 = vmatpush3.bf16.msra.mxu0 %v1348_v4 }
 0x2d5   :  { %1275 = vmatprep.subr.bf16.mxu0 %v1434_v3 }
 0x2d8   :  { %1276 = vmatpush3.bf16.msra.mxu0 %v1349_v14 }
 0x2d9   :  { %1277 = vmatprep.subr.bf16.mxu0 %v1434_v3 }
 0x2dc   :  { %1278 = vmatpush3.bf16.msra.mxu0 %v1350_v15 }
 0x37f   :  { %v787_v6 = vpop.f32.mrf.mxu0 }
 0x380   :  { %v788_v7 = vadd.f32 %v1074_v5, %v787_v6 }
 0x381   :  { %v1241_v8 = vpop.f32.mrf.mxu0 }
 0x382   :  { %v793_v9 = vmax.f32 %v788_v7, 0.0 }
 0x383   :  { %v790_v10 = vpop.f32.mrf.mxu0 }
 0x384   :  { %v811_v11 = vpack.c.bf16 %v793_v9, %v793_v9 }
 0x385   :  { %v1242_v12 = vpop.f32.mrf.mxu0 }
 0x386   :  { %1260 = vmatmul.mubr.bf16.vlgmr.msra.gmra.mxu1 %v811_v11 }
 0x446   :  { %v898_v17 = vpop.f32.mrf.mxu1 }
 0x447   :  { %v899_v19 = vadd.f32 %v1083_v16, %v898_v17 }
 0x448   :  { %v1261_v20 = vpop.f32.mrf.mxu1 }
 0x449   :  { %v904_v21 = vmax.f32 %v899_v19, 0.0 }
 0x44a   :  { %v901_v22 = vpop.f32.mrf.mxu1 }
 0x44b   :  { %v922_v23 = vpack.c.bf16 %v904_v21, %v904_v21 }
 0x44c   :  { %v1262_v24 = vpop.f32.mrf.mxu1 }
 0x44d   :  { %1280 = vmatmul.mubr.bf16.vlgmr.msra.gmra.mxu0 %v922_v23 }
 0x50d   :  { %v1009_v26 = vpop.f32.mrf.mxu0 }
 0x50e   :  { %v1010_v3 = vadd.f32 %v1092_v25, %v1009_v26 }
 0x50f   :  { %v1281_v27 = vpop.f32.mrf.mxu0 }
 0x510   :  { %v1015_v28 = vmax.f32 %v1010_v3, 0.0 }
 0x511   :  { %v1012_v29 = vpop.f32.mrf.mxu0 }
 0x512   :  { %1016 = vst [vmem:[#allocation7] sm:$0xff] %v1015_v28 }
 0x513   :  { %v1282_v30 = vpop.f32.mrf.mxu0 }
 0x514   :  { %1414 = shalt.err (!%p1411_p0)
}
 0x515   :  { %1026 = dma.vmem_to_hbm [thread:$0]  %s1024_s21, 128, %s1599_s5, [#allocation4]  }
 0x516   :  { %1427 = dma.done.wait [#allocation4], 128  }
 0x517   :  { %1428 = vsyncadd [#allocation4], 4294967168 }
 0x518   :  { %1030 = vsyncpa [#allocation3], 1 }
 0x519   :  { %1031 = vsyncpa [#allocation6], 1 }
 0x51a   :  { %1032 = vsyncpa [#allocation4], 1 }

// kernel: tpu_custom_call.1
= control target key start
LH: loop header
LB: loop body
LE: loop exit
PB: predicated region body
PF: predicated region fallthrough
CT: control target
= control target key end

     0   :  { %10 = vsyncpa [#allocation3], 0  ;;  %s1594_s0 = inlined_call_operand.vmem [shape: f32[8,16], index: 0, kind: input, shape index: {}]   ;;  %s1595_s1 = inlined_call_operand.vmem [shape: f32[8,1], index: 1, kind: input, shape index: {}]   ;;  %s1596_s2 = inlined_call_operand.hbm [shape: f32[1,128], index: 2, kind: input, shape index: {}]   ;;  %s1597_s3 = inlined_call_operand.hbm [shape: bf16[896,128], index: 3, kind: input, shape index: {}]   ;;  %s1598_s4 = inlined_call_operand.vmem [shape: f32[8,128], index: 4, kind: input, shape index: {}]   ;;  %s1599_s5 = inlined_call_operand.hbm [shape: f32[8,128], index: 5, kind: output, shape index: {}]  }
   0x1   :  { %11 = vsyncpa [#allocation6], 0 }
   0x2   :  { %12 = vsyncpa [#allocation4], 0  ;;  %s1429_s18 = smov [#allocation2]   ;;  %s1430_s20 = smov [#allocation5]  }
   0x3   :  { %s23_s19 = sshll.u32 %s1429_s18, 4  ;;  %s32_s21 = sshll.u32 %s1430_s20, 4  ;;  %s24_s19 = int_to_ptr.vmem [resolvable:$true] %s23_s19  ;;  %s33_s21 = int_to_ptr.vmem [resolvable:$true] %s32_s21 }
   0x4   :  { %s1371_s22 = scalar_lea.vmem %s24_s19, 16  ;;  %s1375_s23 = scalar_lea.vmem %s24_s19, 32 }
   0x5   :  { %p1372_p0 = scmp.ne.s32.totalorder %s24_s19, %s1371_s22  ;;  %p1376_p1 = scmp.lt.s32.totalorder %s24_s19, %s24_s19 }
   0x6   :  { %p1377_p2 = scmp.lt.s32.totalorder %s1375_s23, %s1371_s22 }
   0x8   :  { %p1378_p3 = por %p1377_p2, %p1376_p1 }
   0xa   :  { %p1379_p4 = pnand %p1378_p3, %p1372_p0 }
   0xc   :  { %1382 = shalt.err (!%p1379_p4)
}
   0xd   :  { %26 = dma.hbm_to_vmem [thread:$0]  %s1596_s2, 16, %s24_s19, [#allocation3]  }
   0xe   :  { %s1391_s26 = scalar_lea.vmem %s33_s21, 7168  ;;  %p1396_p6 = scmp.lt.s32.totalorder %s33_s21, %s33_s21 }
   0xf   :  { %p1392_p5 = scmp.ne.s32.totalorder %s33_s21, %s1391_s26  ;;  %p1397_p7 = scmp.lt.s32.totalorder %s1391_s26, %s1391_s26 }
  0x11   :  { %p1398_p8 = por %p1397_p7, %p1396_p6 }
  0x13   :  { %p1399_p9 = pnand %p1398_p8, %p1392_p5 }
  0x15   :  { %1402 = shalt.err (!%p1399_p9)
}
  0x16   :  { %s1431_s27 = smov 64   ;;  %s1432_s28 = smov 4  }
  0x17   :  { %38 = dma.hbm_to_vmem [thread:$0]  %s1597_s3, 7168, %s33_s21, [#allocation6], %s1431_s27, %s1431_s27, %s1432_s28  }
  0x18   :  { %1423 = dma.done.wait [#allocation3], 16  }
  0x19   :  { %1424 = vsyncadd [#allocation3], 4294967280 }
  0x1a   :  { %1425 = dma.done.wait [#allocation6], 7168  }
  0x1b   :  { %1426 = vsyncadd [#allocation6], 4294960128  ;;  %v1433_v0 = vmov 0   ;;  %v48_v1 = vld [vmem:[%s1595_s1] sm:$0xff]  ;;  %v1434_v3 = vmov 0.0   ;;  %v1303_v4 = vld [vmem:[#allocation5 + $0x30] sm:$0xff]  }
  0x1c   :  { %1301 = vset.pattern.permute.xlu0 %v1433_v0  ;;  %v1302_v2 = vld [vmem:[#allocation5 + $0x38] sm:$0xff]   ;;  %1157 = vmatprep.subr.bf16.mxu0 %v1434_v3  ;;  %v1304_v5 = vld [vmem:[#allocation5 + $0x28] sm:$0xff]   ;;  %v1305_v6 = vld [vmem:[#allocation5 + $0x20] sm:$0xff]   ;;  %vm1435_vm0 = vmmov 0   ;;  %v1436_v24 = vmov 683565275  }
  0x1d   :  { %52 = vperm.xlu0 %1301, %v48_v1   ;;  %1177 = vmatprep.subr.bf16.mxu1 %v1434_v3  ;;  %v1306_v7 = vld [vmem:[#allocation5 + $0x18] sm:$0xff]   ;;  %v1307_v8 = vld [vmem:[#allocation5 + $0x10] sm:$0xff]   ;;  %v1308_v9 = vld [vmem:[#allocation5 + $0x8] sm:$0xff]   ;;  %v1437_v26 = vmov 2475754826   ;;  %s1442_s20 = smov [#allocation7]  }
  0x1e   :  { %1158 = vmatpush3.bf16.msra.mxu0 %v1302_v2  ;;  %1173 = vmatprep.mubr.msk.bf16.mxu0 %vm1435_vm0, %v1434_v3  ;;  %v1309_v10 = vld [vmem:[#allocation5] sm:$0xff]   ;;  %v1033_v11 = vld [vmem:[#allocation2] ss:$0 sm:$0xff]  ;;  %v1438_v29 = vmov 2131351028   ;;  %s1023_s21 = sshll.u32 %s1442_s20, 4  ;;  %s1024_s21 = int_to_ptr.vmem [resolvable:$true] %s1023_s21 }
  0x1f   :  { %1159 = vmatprep.subr.bf16.mxu0 %v1434_v3  ;;  %1193 = vmatprep.mubr.msk.bf16.mxu1 %vm1435_vm0, %v1434_v3  ;;  %v1439_v32 = vmov 2102212464   ;;  %v1440_v35 = vmov 920167782   ;;  %v1441_v38 = vmov 1326507024   ;;  %p1408_p11 = scmp.lt.s32.totalorder %s1024_s21, %s1024_s21 }
  0x20   :  { %s1403_s22 = scalar_lea.vmem %s1024_s21, 128 }
  0x21   :  { %p1404_p10 = scmp.ne.s32.totalorder %s1024_s21, %s1403_s22  ;;  %p1409_p12 = scmp.lt.s32.totalorder %s1403_s22, %s1403_s22 }
  0x22   :  { %1160 = vmatpush3.bf16.msra.mxu0 %v1303_v4 }
  0x23   :  { %1161 = vmatprep.subr.bf16.mxu0 %v1434_v3  ;;  %p1410_p13 = por %p1409_p12, %p1408_p11 }
  0x25   :  { %p1411_p0 = pnand %p1410_p13, %p1404_p10 }
  0x26   :  { %1162 = vmatpush3.bf16.msra.mxu0 %v1304_v5 }
  0x27   :  { %1163 = vmatprep.subr.bf16.mxu0 %v1434_v3 }
  0x2a   :  { %1164 = vmatpush3.bf16.msra.mxu0 %v1305_v6 }
  0x2b   :  { %1165 = vmatprep.subr.bf16.mxu0 %v1434_v3 }
  0x2e   :  { %1166 = vmatpush3.bf16.msra.mxu0 %v1306_v7 }
  0x2f   :  { %1167 = vmatprep.subr.bf16.mxu0 %v1434_v3 }
  0x32   :  { %1168 = vmatpush3.bf16.msra.mxu0 %v1307_v8 }
  0x33   :  { %1169 = vmatprep.subr.bf16.mxu0 %v1434_v3 }
  0x36   :  { %1170 = vmatpush3.bf16.msra.mxu0 %v1308_v9 }
  0x37   :  { %1171 = vmatprep.subr.bf16.mxu0 %v1434_v3 }
  0x3a   :  { %1172 = vmatpush3.bf16.msra.mxu0 %v1309_v10 }
  0x3b   :  { %1197 = vmatprep.subr.bf16.mxu0 %v1434_v3 }
  0x98   :  { %v53_v12 = vpop.permute.xlu0 %52 }
  0x99   :  { %v1496_v13 = vmul.f32 %v1033_v11, %v53_v12 }
  0x9b   :  { %v68_v14 = vand.u32 2139095040, %v1496_v13  ;;  %v65_v18 = vand.u32 2147483647, %v1496_v13  ;;  %vm67_vm8 = vcmp.lt.s32.totalorder %v1496_v13, 0 }
  0x9d   :  { %v69_v15 = vshrl.u32 %v68_v14, 23  ;;  %v72_v21 = vand.u32 8388607, %v65_v18  ;;  %vm66_vm9 = vcmp.le.f32.partialorder %v65_v18, 0.7853982 }
  0x9f   :  { %v1034_v16 = vadd.s32 4294967169, %v69_v15  ;;  %v73_v40 = vor.u32 8388608, %v72_v21 }
  0xa1   :  { %v75_v17 = vadd.s32 1, %v1034_v16  ;;  %v113_v54 = vshll.u32 %v73_v40, 8 }
  0xa3   :  { %vm76_vm1 = vcmp.gt.s32.totalorder %v75_v17, 0 }
  0xa4   :  { %v77_v19 = vsel %vm76_vm1, %v75_v17, 0 }
  0xa5   :  { %v79_v20 = vand.u32 31, %v77_v19  ;;  %v78_v23 = vshrl.u32 %v77_v19, 5 }
  0xa7   :  { %v80_v22 = vsub.s32 32, %v79_v20  ;;  %v82_v25 = vshll.u32 %v1436_v24, %v79_v20  ;;  %v85_v27 = vshll.u32 %v1437_v26, %v79_v20  ;;  %v88_v31 = vshll.u32 %v1438_v29, %v79_v20 }
  0xa8   :  { %v91_v34 = vshll.u32 %v1439_v32, %v79_v20  ;;  %v94_v37 = vshll.u32 %v1440_v35, %v79_v20  ;;  %vm97_vm2 = vcmp.lt.s32.totalorder %v78_v23, 1  ;;  %vm100_vm3 = vcmp.lt.s32.totalorder %v78_v23, 4 }
  0xa9   :  { %v83_v28 = vshrl.u32 %v1437_v26, %v80_v22  ;;  %v86_v30 = vshrl.u32 %v1438_v29, %v80_v22  ;;  %v89_v33 = vshrl.u32 %v1439_v32, %v80_v22  ;;  %v92_v36 = vshrl.u32 %v1440_v35, %v80_v22 }
  0xaa   :  { %v95_v39 = vshrl.u32 %v1441_v38, %v80_v22  ;;  %v81_v49 = vshrl.u32 %v1436_v24, %v80_v22  ;;  %vm99_vm4 = vcmp.lt.s32.totalorder %v78_v23, 3  ;;  %vm98_vm5 = vcmp.lt.s32.totalorder %v78_v23, 2 }
  0xab   :  { %v84_v41 = vor.u32 %v83_v28, %v82_v25  ;;  %v87_v42 = vor.u32 %v86_v30, %v85_v27  ;;  %v90_v43 = vor.u32 %v89_v33, %v88_v31  ;;  %v93_v44 = vor.u32 %v92_v36, %v91_v34 }
  0xac   :  { %v96_v45 = vor.u32 %v95_v39, %v94_v37  ;;  %v62_v34 = vlaneseq }
  0xad   :  { %v102_v46 = vsel %vm100_vm3, %v90_v43, 2102212464  ;;  %v105_v47 = vsel %vm97_vm2, %v84_v41, %v87_v42  ;;  %v109_v48 = vsel %vm97_vm2, %v87_v42, %v90_v43  ;;  %v106_v50 = vsel %vm100_vm3, %v93_v44, 920167782 }
  0xae   :  { %v110_v51 = vsel %vm100_vm3, %v96_v45, 1326507024  ;;  %v107_v52 = vsel %vm99_vm4, %v90_v43, %v106_v50  ;;  %v101_v55 = vsel %vm97_vm2, %v81_v49, %v84_v41  ;;  %v103_v56 = vsel %vm99_vm4, %v87_v42, %v102_v46 }
  0xaf   :  { %v111_v53 = vsel %vm99_vm4, %v93_v44, %v110_v51  ;;  %v108_v57 = vsel %vm98_vm5, %v105_v47, %v107_v52  ;;  %v104_v63 = vsel %vm98_vm5, %v101_v55, %v103_v56  ;;  %v63_v36 = vand.u32 127, %v62_v34  ;;  %v1310_v52 = vld [vmem:[#allocation5 + $0x80] sm:$0xff]   ;;  %v1311_v55 = vld [vmem:[#allocation5 + $0x78] sm:$0xff]   ;;  %v1312_v56 = vld [vmem:[#allocation5 + $0x70] sm:$0xff]  }
  0xb0   :  { %v112_v58 = vsel %vm98_vm5, %v109_v48, %v111_v53  ;;  %v1505_v61 = vmul.u32.u64.low %v113_v54, %v108_v57  ;;  %v1506_v62 = vmul.u32.u64.high %v113_v54, %v108_v57, %v1505_v61  ;;  %v120_v1 = vmul.u32 %v113_v54, %v104_v63  ;;  %1178 = vmatpush3.bf16.msra.mxu1 %v1311_v55  ;;  %v1313_v57 = vld [vmem:[#allocation5 + $0x68] sm:$0xff]   ;;  %v1042_v63 = vld [vmem:[%s1598_s4] ss:$0 sm:$0xff] }
  0xb1   :  { %v1502_v59 = vmul.u32.u64.low %v113_v54, %v112_v58  ;;  %v1503_v60 = vmul.u32.u64.high %v113_v54, %v112_v58, %v1502_v59  ;;  %vm168_vm11 = vcmp.lt.s32.totalorder %v63_v36, 64  ;;  %vm64_vm2 = vcmp.lt.s32.totalorder %v63_v36, 32  ;;  %v506_v54 = vld [vmem:[%s1594_s0] sm:$0xff]  ;;  %1179 = vmatprep.subr.bf16.mxu1 %v1434_v3  ;;  %v1329_v36 = vld [vmem:[#allocation5 + $0x128] sm:$0xff]  }
  0xb2   :  { %v123_v0 = vadd.s32 1, %v1506_v62  ;;  %vm157_vm3 = vweird.f32 %v1496_v13  ;;  %vm521_vm4 = vcmask 130048   ;;  %v1314_v58 = vld [vmem:[#allocation5 + $0x60] sm:$0xff]   ;;  %v1315_v59 = vld [vmem:[#allocation5 + $0x58] sm:$0xff]  }
  0xb3   :  { %vm122_vm6 = vc.u32 %v1503_v60, %v1505_v61  ;;  %v121_v15 = vadd.s32 %v1505_v61, %v1503_v60  ;;  %v1316_v60 = vld [vmem:[#allocation5 + $0x50] sm:$0xff]   ;;  %v1317_v61 = vld [vmem:[#allocation5 + $0x48] sm:$0xff]   ;;  %v1327_v34 = vld [vmem:[#allocation5 + $0x138] sm:$0xff]  }
  0xb4   :  { %v124_v2 = vsel %vm122_vm6, %v123_v0, %v1506_v62  ;;  %1180 = vmatpush3.bf16.msra.mxu1 %v1312_v56  ;;  %v1318_v62 = vld [vmem:[#allocation5 + $0x40] sm:$0xff]  }
  0xb5   :  { %v125_v4 = vadd.s32 %v124_v2, %v120_v1  ;;  %1181 = vmatprep.subr.bf16.mxu1 %v1434_v3 }
  0xb7   :  { %v126_v5 = vadd.s32 536870912, %v125_v4 }
  0xb8   :  { %1182 = vmatpush3.bf16.msra.mxu1 %v1313_v57 }
  0xb9   :  { %v127_v6 = vshrl.u32 %v126_v5, 30  ;;  %1183 = vmatprep.subr.bf16.mxu1 %v1434_v3 }
  0xbb   :  { %v128_v7 = vshll.u32 %v127_v6, 30  ;;  %v151_v29 = vsub.s32 4, %v127_v6 }
  0xbc   :  { %1184 = vmatpush3.bf16.msra.mxu1 %v1314_v58 }
  0xbd   :  { %v129_v8 = vsub.s32 %v125_v4, %v128_v7  ;;  %v152_v32 = vsel %vm67_vm8, %v151_v29, %v127_v6  ;;  %1185 = vmatprep.subr.bf16.mxu1 %v1434_v3  ;;  %v1325_v29 = vld [vmem:[#allocation5 + $0xc8] sm:$0xff]  }
  0xbe   :  { %v154_v33 = vsel %vm66_vm9, 0, %v152_v32 }
  0xbf   :  { %v131_v9 = vsub.s32 0, %v129_v8  ;;  %v262_v35 = vadd.s32 3, %v154_v33  ;;  %v158_v37 = vand.u32 3, %v154_v33 }
  0xc0   :  { %1186 = vmatpush3.bf16.msra.mxu1 %v1315_v59 }
  0xc1   :  { %v1035_v10 = vmin.u32 %v131_v9, %v129_v8  ;;  %v263_v38 = vand.u32 3, %v262_v35  ;;  %vm163_vm10 = vcmp.eq.s32.totalorder %v158_v37, 2  ;;  %vm160_vm13 = vcmp.eq.s32.totalorder %v158_v37, 0  ;;  %1187 = vmatprep.subr.bf16.mxu1 %v1434_v3  ;;  %v1328_v35 = vld [vmem:[#allocation5 + $0x130] sm:$0xff]  }
  0xc2   :  { %vm159_vm15 = vcmp.lt.s32.totalorder %v158_v37, 2  ;;  %v1330_v37 = vld [vmem:[#allocation5 + $0x120] sm:$0xff]  }
  0xc3   :  { %v133_v11 = vclz %v1035_v10  ;;  %vm268_vm12 = vcmp.eq.s32.totalorder %v263_v38, 2  ;;  %vm265_vm14 = vcmp.eq.s32.totalorder %v263_v38, 0  ;;  %vm264_vm1 = vcmp.lt.s32.totalorder %v263_v38, 2  ;;  %v1331_v38 = vld [vmem:[#allocation5 + $0x118] sm:$0xff]  }
  0xc4   :  { %1188 = vmatpush3.bf16.msra.mxu1 %v1316_v60  ;;  %v1341_v60 = vld [vmem:[#allocation5 + $0x148] sm:$0xff]  }
  0xc5   :  { %v1036_v12 = vadd.s32 4294967294, %v133_v11  ;;  %1189 = vmatprep.subr.bf16.mxu1 %v1434_v3 }
  0xc7   :  { %vm1037_vm7 = vcmp.lt.s32.totalorder %v1036_v12, 0 }
  0xc8   :  { %v136_v14 = vsel %vm1037_vm7, 0, %v1036_v12  ;;  %1190 = vmatpush3.bf16.msra.mxu1 %v1317_v61  ;;  %v1061_v12 = vld [vmem:[%s1598_s4 + $0x2] ss:$0 sm:$0xff] }
  0xc9   :  { %v137_v16 = vsub.s32 32, %v136_v14  ;;  %v141_v17 = vsub.s32 4294967266, %v136_v14  ;;  %v138_v19 = vshll.u32 %v129_v8, %v136_v14  ;;  %1191 = vmatprep.subr.bf16.mxu1 %v1434_v3  ;;  %v1342_v61 = vld [vmem:[#allocation5 + $0x140] sm:$0xff]  }
  0xcb   :  { %v139_v20 = vshrl.u32 %v121_v15, %v137_v16  ;;  %v142_v21 = vadd.s32 127, %v141_v17 }
  0xcc   :  { %1192 = vmatpush3.bf16.msra.mxu1 %v1318_v62  ;;  %v1343_v62 = vld [vmem:[#allocation5 + $0x1b8] sm:$0xff]  }
  0xcd   :  { %v140_v22 = vor.u32 %v139_v20, %v138_v19  ;;  %v143_v23 = vshll.u32 %v142_v21, 23  ;;  %1203 = vmatprep.subr.bf16.mxu1 %v1434_v3  ;;  %v1319_v20 = vld [vmem:[#allocation5 + $0xf8] sm:$0xff]  }
  0xcf   :  { %v144_v24 = vor.u32 4788187, %v143_v23  ;;  %v147_v26 = vcvt.s32.f32 %v140_v22  ;;  %v1320_v22 = vld [vmem:[#allocation5 + $0xf0] sm:$0xff]  }
  0xd1   :  { %v145_v25 = vand.u32 2147483647, %v144_v24  ;;  %v1321_v24 = vld [vmem:[#allocation5 + $0xe8] sm:$0xff]  }
  0xd3   :  { %v148_v27 = vmul.f32 %v147_v26, %v145_v25  ;;  %v1322_v26 = vld [vmem:[#allocation5 + $0xe0] sm:$0xff]  }
  0xd5   :  { %v149_v28 = vxor.u32 2147483648, %v148_v27 }
  0xd7   :  { %v150_v30 = vsel %vm67_vm8, %v149_v28, %v148_v27  ;;  %v1323_v27 = vld [vmem:[#allocation5 + $0xd8] sm:$0xff]   ;;  %v1324_v28 = vld [vmem:[#allocation5 + $0xd0] sm:$0xff]  }
  0xd8   :  { %v153_v31 = vsel %vm66_vm9, %v1496_v13, %v150_v30  ;;  %v510_v13 = vpack.c.bf16 %v506_v54, %v506_v54 }
  0xd9   :  { %1351 = vcosq.f32 %v153_v31 }
  0xda   :  { %1353 = vsinq.f32 %v153_v31  ;;  %v1326_v31 = vld [vmem:[#allocation5 + $0xc0] sm:$0xff]  }
  0xe6   :  { %v1352_v39 = vpop.eup %1351 }
  0xe7   :  { %v1354_v40 = vpop.eup %1353  ;;  %v164_v41 = vxor.u32 2147483648, %v1352_v39 }
  0xe8   :  { %v161_v42 = vxor.u32 2147483648, %v1354_v40 }
  0xe9   :  { %v165_v18 = vsel %vm163_vm10, %v164_v41, %v1354_v40  ;;  %v270_v43 = vsel %vm268_vm12, %v164_v41, %v1354_v40  ;;  %v1333_v40 = vld [vmem:[#allocation5 + $0x108] sm:$0xff]   ;;  %v1334_v41 = vld [vmem:[#allocation5 + $0x100] sm:$0xff]  }
  0xea   :  { %v162_v44 = vsel %vm160_vm13, %v1352_v39, %v161_v42  ;;  %v267_v45 = vsel %vm265_vm14, %v1352_v39, %v161_v42  ;;  %v1332_v39 = vld [vmem:[#allocation5 + $0x110] sm:$0xff]   ;;  %v1335_v42 = vld [vmem:[#allocation5 + $0x178] sm:$0xff]  }
  0xeb   :  { %v166_v46 = vsel %vm159_vm15, %v162_v44, %v165_v18  ;;  %v271_v47 = vsel %vm264_vm1, %v267_v45, %v270_v43  ;;  %v1336_v18 = vld [vmem:[#allocation5 + $0x170] sm:$0xff]   ;;  %v1337_v43 = vld [vmem:[#allocation5 + $0x168] sm:$0xff]   ;;  %v1338_v44 = vld [vmem:[#allocation5 + $0x160] sm:$0xff]  }
  0xec   :  { %v167_v48 = vsel %vm157_vm3, nan, %v166_v46  ;;  %v272_v49 = vsel %vm157_vm3, nan, %v271_v47  ;;  %v1339_v45 = vld [vmem:[#allocation5 + $0x158] sm:$0xff]   ;;  %v1340_v46 = vld [vmem:[#allocation5 + $0x150] sm:$0xff]  }
  0xed   :  { %v275_v50 = vsel %vm168_vm11, %v272_v49, 0.0 }
  0xee   :  { %v278_v51 = vsel %vm64_vm2, %v167_v48, %v275_v50 }
  0xef   :  { %v296_v53 = vpack.c.bf16 %v278_v51, %v278_v51  ;;  %v1052_v51 = vld [vmem:[%s1598_s4 + $0x1] ss:$0 sm:$0xff] }
  0xf1   :  { %1174 = vmatmul.mubr.bf16.vlgmr.msra.gmra.mxu0 %v296_v53 }
  0xf2   :  { %1198 = vmatpush3.bf16.msra.mxu0 %v1310_v52  ;;  %1199 = vmatprep.mubr.msk.bf16.mxu0 %vm1435_vm0, %v1434_v3  ;;  %v1065_v52 = vld [vmem:[%s1598_s4 + $0x3] ss:$0 sm:$0xff] }
  0xf3   :  { %1223 = vmatprep.subr.bf16.mxu0 %v1434_v3 }
  0xf9   :  { %1200 = vmatmul.mubr.msk.bf16.vlgmr.msra.gmra.mxu0 %vm521_vm4, %v510_v13 }
  0xfa   :  { %1239 = vmatprep.mubr.msk.bf16.mxu0 %vm1435_vm0, %v1434_v3  ;;  %1224 = vmatpush3.bf16.msra.mxu0 %v1327_v34 }
  0xfb   :  { %1225 = vmatprep.subr.bf16.mxu0 %v1434_v3 }
  0xfe   :  { %1226 = vmatpush3.bf16.msra.mxu0 %v1328_v35 }
  0xff   :  { %1227 = vmatprep.subr.bf16.mxu0 %v1434_v3 }
 0x102   :  { %1228 = vmatpush3.bf16.msra.mxu0 %v1329_v36 }
 0x103   :  { %1229 = vmatprep.subr.bf16.mxu0 %v1434_v3 }
 0x106   :  { %1230 = vmatpush3.bf16.msra.mxu0 %v1330_v37 }
 0x107   :  { %1231 = vmatprep.subr.bf16.mxu0 %v1434_v3 }
 0x10a   :  { %1232 = vmatpush3.bf16.msra.mxu0 %v1331_v38 }
 0x10b   :  { %1233 = vmatprep.subr.bf16.mxu0 %v1434_v3 }
 0x10e   :  { %1234 = vmatpush3.bf16.msra.mxu0 %v1332_v39 }
 0x10f   :  { %1235 = vmatprep.subr.bf16.mxu0 %v1434_v3 }
 0x112   :  { %1236 = vmatpush3.bf16.msra.mxu0 %v1333_v40 }
 0x113   :  { %1237 = vmatprep.subr.bf16.mxu0 %v1434_v3 }
 0x116   :  { %1238 = vmatpush3.bf16.msra.mxu0 %v1334_v41 }
 0x117   :  { %1263 = vmatprep.subr.bf16.mxu0 %v1434_v3 }
 0x1b1   :  { %v383_v0 = vpop.f32.mrf.mxu0 }
 0x1b2   :  { %v384_v1 = vadd.f32 %v1042_v63, %v383_v0  ;;  %v1344_v63 = vld [vmem:[#allocation5 + $0x1b0] sm:$0xff]   ;;  %v1345_v0 = vld [vmem:[#allocation5 + $0x1a8] sm:$0xff]  }
 0x1b3   :  { %v1175_v2 = vpop.f32.mrf.mxu0 }
 0x1b4   :  { %v1051_v4 = vmul.f32 -1.442695, %v384_v1  ;;  %v1347_v2 = vld [vmem:[#allocation5 + $0x198] sm:$0xff]  }
 0x1b5   :  { %v386_v5 = vpop.f32.mrf.mxu0 }
 0x1b6   :  { %1355 = vpow2.f32 %v1051_v4  ;;  %v1348_v4 = vld [vmem:[#allocation5 + $0x190] sm:$0xff]   ;;  %v1074_v5 = vld [vmem:[%s1598_s4 + $0x4] ss:$0 sm:$0xff] }
 0x1b7   :  { %v1176_v6 = vpop.f32.mrf.mxu0 }
 0x1b9   :  { %v559_v7 = vpop.f32.mrf.mxu0 }
 0x1ba   :  { %v560_v15 = vadd.f32 %v1061_v12, %v559_v7 }
 0x1bb   :  { %v1201_v8 = vpop.f32.mrf.mxu0 }
 0x1bc   :  { %v1064_v16 = vmul.f32 -1.442695, %v560_v15 }
 0x1bd   :  { %v562_v9 = vpop.f32.mrf.mxu0 }
 0x1bf   :  { %v1202_v10 = vpop.f32.mrf.mxu0 }
 0x1c3   :  { %v1356_v11 = vpop.eup %1355 }
 0x1c4   :  { %v392_v14 = vadd.f32 1.0, %v1356_v11 }
 0x1c6   :  { %1357 = vrcp.f32 %v392_v14  ;;  %v1349_v14 = vld [vmem:[#allocation5 + $0x188] sm:$0xff]  }
 0x1c7   :  { %1359 = vpow2.f32 %v1064_v16  ;;  %v1083_v16 = vld [vmem:[%s1598_s4 + $0x5] ss:$0 sm:$0xff] }
 0x1d3   :  { %v1358_v17 = vpop.eup %1357 }
 0x1d4   :  { %v395_v19 = vmul.f32 %v1358_v17, %v384_v1  ;;  %v1360_v23 = vpop.eup %1359  ;;  %v1346_v1 = vld [vmem:[#allocation5 + $0x1a0] sm:$0xff]  }
 0x1d5   :  { %v568_v25 = vadd.f32 1.0, %v1360_v23 }
 0x1d6   :  { %v413_v21 = vpack.c.bf16 %v395_v19, %v395_v19 }
 0x1d7   :  { %1361 = vrcp.f32 %v568_v25  ;;  %v1092_v25 = vld [vmem:[%s1598_s4 + $0x6] ss:$0 sm:$0xff] }
 0x1d8   :  { %1194 = vmatmul.mubr.bf16.vlgmr.msra.gmra.mxu1 %v413_v21 }
 0x1d9   :  { %1204 = vmatpush3.bf16.msra.mxu1 %v1319_v20  ;;  %1219 = vmatprep.mubr.msk.bf16.mxu1 %vm1435_vm0, %v1434_v3 }
 0x1da   :  { %1205 = vmatprep.subr.bf16.mxu1 %v1434_v3 }
 0x1dd   :  { %1206 = vmatpush3.bf16.msra.mxu1 %v1320_v22 }
 0x1de   :  { %1207 = vmatprep.subr.bf16.mxu1 %v1434_v3 }
 0x1e1   :  { %1208 = vmatpush3.bf16.msra.mxu1 %v1321_v24 }
 0x1e2   :  { %1209 = vmatprep.subr.bf16.mxu1 %v1434_v3 }
 0x1e4   :  { %v1362_v30 = vpop.eup %1361 }
 0x1e5   :  { %1210 = vmatpush3.bf16.msra.mxu1 %v1322_v26  ;;  %v571_v32 = vmul.f32 %v1362_v30, %v560_v15  ;;  %v1350_v15 = vld [vmem:[#allocation5 + $0x180] sm:$0xff]  }
 0x1e6   :  { %1211 = vmatprep.subr.bf16.mxu1 %v1434_v3 }
 0x1e7   :  { %v589_v33 = vpack.c.bf16 %v571_v32, %v571_v32 }
 0x1e9   :  { %1212 = vmatpush3.bf16.msra.mxu1 %v1323_v27 }
 0x1ea   :  { %1213 = vmatprep.subr.bf16.mxu1 %v1434_v3 }
 0x1ed   :  { %1214 = vmatpush3.bf16.msra.mxu1 %v1324_v28 }
 0x1ee   :  { %1215 = vmatprep.subr.bf16.mxu1 %v1434_v3 }
 0x1f1   :  { %1216 = vmatpush3.bf16.msra.mxu1 %v1325_v29 }
 0x1f2   :  { %1217 = vmatprep.subr.bf16.mxu1 %v1434_v3 }
 0x1f5   :  { %1218 = vmatpush3.bf16.msra.mxu1 %v1326_v31 }
 0x1f6   :  { %1243 = vmatprep.subr.bf16.mxu1 %v1434_v3 }
 0x1f8   :  { %1220 = vmatmul.mubr.bf16.vlgmr.msra.gmra.mxu1 %v589_v33 }
 0x1f9   :  { %1259 = vmatprep.mubr.msk.bf16.mxu1 %vm1435_vm0, %v1434_v3  ;;  %1244 = vmatpush3.bf16.msra.mxu1 %v1335_v42 }
 0x1fa   :  { %1245 = vmatprep.subr.bf16.mxu1 %v1434_v3 }
 0x1fd   :  { %1246 = vmatpush3.bf16.msra.mxu1 %v1336_v18 }
 0x1fe   :  { %1247 = vmatprep.subr.bf16.mxu1 %v1434_v3 }
 0x201   :  { %1248 = vmatpush3.bf16.msra.mxu1 %v1337_v43 }
 0x202   :  { %1249 = vmatprep.subr.bf16.mxu1 %v1434_v3 }
 0x205   :  { %1250 = vmatpush3.bf16.msra.mxu1 %v1338_v44 }
 0x206   :  { %1251 = vmatprep.subr.bf16.mxu1 %v1434_v3 }
 0x209   :  { %1252 = vmatpush3.bf16.msra.mxu1 %v1339_v45 }
 0x20a   :  { %1253 = vmatprep.subr.bf16.mxu1 %v1434_v3 }
 0x20d   :  { %1254 = vmatpush3.bf16.msra.mxu1 %v1340_v46 }
 0x20e   :  { %1255 = vmatprep.subr.bf16.mxu1 %v1434_v3 }
 0x211   :  { %1256 = vmatpush3.bf16.msra.mxu1 %v1341_v60 }
 0x212   :  { %1257 = vmatprep.subr.bf16.mxu1 %v1434_v3 }
 0x215   :  { %1258 = vmatpush3.bf16.msra.mxu1 %v1342_v61 }
 0x298   :  { %v500_v47 = vpop.f32.mrf.mxu1 }
 0x299   :  { %v501_v54 = vadd.f32 %v1052_v51, %v500_v47 }
 0x29a   :  { %v1195_v48 = vpop.f32.mrf.mxu1 }
 0x29c   :  { %v503_v49 = vpop.f32.mrf.mxu1 }
 0x29e   :  { %v1196_v50 = vpop.f32.mrf.mxu1 }
 0x2b8   :  { %v676_v53 = vpop.f32.mrf.mxu1 }
 0x2b9   :  { %v677_v13 = vadd.f32 %v1065_v52, %v676_v53 }
 0x2ba   :  { %v1221_v55 = vpop.f32.mrf.mxu1 }
 0x2bb   :  { %v682_v56 = vadd.f32 %v677_v13, %v501_v54 }
 0x2bc   :  { %v679_v57 = vpop.f32.mrf.mxu1 }
 0x2bd   :  { %v700_v58 = vpack.c.bf16 %v682_v56, %v682_v56 }
 0x2be   :  { %v1222_v59 = vpop.f32.mrf.mxu1 }
 0x2bf   :  { %1240 = vmatmul.mubr.bf16.vlgmr.msra.gmra.mxu0 %v700_v58 }
 0x2c0   :  { %1279 = vmatprep.mubr.msk.bf16.mxu0 %vm1435_vm0, %v1434_v3  ;;  %1264 = vmatpush3.bf16.msra.mxu0 %v1343_v62 }
 0x2c1   :  { %1265 = vmatprep.subr.bf16.mxu0 %v1434_v3 }
 0x2c4   :  { %1266 = vmatpush3.bf16.msra.mxu0 %v1344_v63 }
 0x2c5   :  { %1267 = vmatprep.subr.bf16.mxu0 %v1434_v3 }
 0x2c8   :  { %1268 = vmatpush3.bf16.msra.mxu0 %v1345_v0 }
 0x2c9   :  { %1269 = vmatprep.subr.bf16.mxu0 %v1434_v3 }
 0x2cc   :  { %1270 = vmatpush3.bf16.msra.mxu0 %v1346_v1 }
 0x2cd   :  { %1271 = vmatprep.subr.bf16.mxu0 %v1434_v3 }
 0x2d0   :  { %1272 = vmatpush3.bf16.msra.mxu0 %v1347_v2 }
 0x2d1   :  { %1273 = vmatprep.subr.bf16.mxu0 %v1434_v3 }
 0x2d4   :  { %1274 = vmatpush3.bf16.msra.mxu0 %v1348_v4 }
 0x2d5   :  { %1275 = vmatprep.subr.bf16.mxu0 %v1434_v3 }
 0x2d8   :  { %1276 = vmatpush3.bf16.msra.mxu0 %v1349_v14 }
 0x2d9   :  { %1277 = vmatprep.subr.bf16.mxu0 %v1434_v3 }
 0x2dc   :  { %1278 = vmatpush3.bf16.msra.mxu0 %v1350_v15 }
 0x37f   :  { %v787_v6 = vpop.f32.mrf.mxu0 }
 0x380   :  { %v788_v7 = vadd.f32 %v1074_v5, %v787_v6 }
 0x381   :  { %v1241_v8 = vpop.f32.mrf.mxu0 }
 0x382   :  { %v793_v9 = vmax.f32 %v788_v7, 0.0 }
 0x383   :  { %v790_v10 = vpop.f32.mrf.mxu0 }
 0x384   :  { %v811_v11 = vpack.c.bf16 %v793_v9, %v793_v9 }
 0x385   :  { %v1242_v12 = vpop.f32.mrf.mxu0 }
 0x386   :  { %1260 = vmatmul.mubr.bf16.vlgmr.msra.gmra.mxu1 %v811_v11 }
 0x446   :  { %v898_v17 = vpop.f32.mrf.mxu1 }
 0x447   :  { %v899_v19 = vadd.f32 %v1083_v16, %v898_v17 }
 0x448   :  { %v1261_v20 = vpop.f32.mrf.mxu1 }
 0x449   :  { %v904_v21 = vmax.f32 %v899_v19, 0.0 }
 0x44a   :  { %v901_v22 = vpop.f32.mrf.mxu1 }
 0x44b   :  { %v922_v23 = vpack.c.bf16 %v904_v21, %v904_v21 }
 0x44c   :  { %v1262_v24 = vpop.f32.mrf.mxu1 }
 0x44d   :  { %1280 = vmatmul.mubr.bf16.vlgmr.msra.gmra.mxu0 %v922_v23 }
 0x50d   :  { %v1009_v26 = vpop.f32.mrf.mxu0 }
 0x50e   :  { %v1010_v3 = vadd.f32 %v1092_v25, %v1009_v26 }
 0x50f   :  { %v1281_v27 = vpop.f32.mrf.mxu0 }
 0x510   :  { %v1015_v28 = vmax.f32 %v1010_v3, 0.0 }
 0x511   :  { %v1012_v29 = vpop.f32.mrf.mxu0 }
 0x512   :  { %1016 = vst [vmem:[#allocation7] sm:$0xff] %v1015_v28 }
 0x513   :  { %v1282_v30 = vpop.f32.mrf.mxu0 }
 0x514   :  { %1414 = shalt.err (!%p1411_p0)
}
 0x515   :  { %1026 = dma.vmem_to_hbm [thread:$0]  %s1024_s21, 128, %s1599_s5, [#allocation4]  }
 0x516   :  { %1427 = dma.done.wait [#allocation4], 128  }
 0x517   :  { %1428 = vsyncadd [#allocation4], 4294967168 }
 0x518   :  { %1030 = vsyncpa [#allocation3], 1 }
 0x519   :  { %1031 = vsyncpa [#allocation6], 1 }
 0x51a   :  { %1032 = vsyncpa [#allocation4], 1 }

</bundles_post_ra>
